<compile_context>
chip_gen: v7x
topology: tpu7x:2x2x1
jax: 0.10.0
libtpu: 0.0.40
codegen_flags: <defaults>
</compile_context>

<pallas_src>
import functools

import jax
import jax.numpy as jnp
from jax.experimental import pallas as pl
from jax.experimental.pallas import tpu as pltpu


def _round_up(x, m):
    return ((x + m - 1) // m) * m


def _sigmoid(x):
    # sigmoid(x) = 0.5 * (tanh(x/2) + 1): transcendental stays on the EUP,
    # no divide on the VALU.
    return 0.5 * jnp.tanh(0.5 * x) + 0.5


def _lstm_kernel(gx_ref, whh_ref, h_out_ref, h_sc, c_sc):
    """One grid step == one (batch block, time chunk).

    gx_ref  : (Tc, Bblk, 4*Hp) f32  -- precomputed x @ W_ih^T + bias (gate-padded)
    whh_ref : (Hp, 4*Hp)            -- W_hh^T, gate-padded (bf16 or f32), resident
    h_out   : (Bblk, Hp) f32        -- last hidden state, written on last chunk
    h_sc/c_sc: (Bblk, Hp) f32 VMEM scratch carried across time chunks
    """
    chunk = pl.program_id(1)
    Tc = gx_ref.shape[0]
    Hp = h_sc.shape[-1]

    @pl.when(chunk == 0)
    def _():
        h_sc[...] = jnp.zeros_like(h_sc)
        c_sc[...] = jnp.zeros_like(c_sc)

    whh = whh_ref[...]                    # resident weights, loaded once per chunk
    mxu_dtype = whh.dtype

    def step(t, carry):
        h, c = carry
        # Only the recurrent projection is on the sequential critical path.
        gates = gx_ref[t] + jnp.dot(h.astype(mxu_dtype), whh,
                                    preferred_element_type=jnp.float32)
        # PyTorch gate order [i, f, g, o]; each slice is a 128-lane-aligned view.
        i_g = _sigmoid(gates[:, 0 * Hp:1 * Hp])
        f_g = _sigmoid(gates[:, 1 * Hp:2 * Hp])
        g_g = jnp.tanh(gates[:, 2 * Hp:3 * Hp])
        o_g = _sigmoid(gates[:, 3 * Hp:4 * Hp])
        c = f_g * c + i_g * g_g           # state math stays f32 (v5e-safe VPU path)
        h = o_g * jnp.tanh(c)
        return h, c

    h, c = jax.lax.fori_loop(0, Tc, step, (h_sc[...], c_sc[...]), unroll=True)
    h_sc[...] = h
    c_sc[...] = c

    @pl.when(chunk == pl.num_programs(1) - 1)
    def _():
        h_out_ref[...] = h.astype(h_out_ref.dtype)


@functools.partial(jax.jit, static_argnames=("mxu_dtype", "time_chunk"))
def lstm_model_forward(x, w_ih, w_hh, b_ih, b_hh, w_fc, b_fc,
                       *, mxu_dtype=jnp.bfloat16, time_chunk=None):
    """x: (B, T, D) float32. Returns (B, output_dim) float32.

    Weights follow torch.nn.LSTM / nn.Linear layouts:
      w_ih (4H, D), w_hh (4H, H), b_ih/b_hh (4H,), w_fc (O, H), b_fc (O,).
    """
    if x.ndim != 3:
        raise ValueError(f"Erwartet eine 3D-Eingabe, erhalten: {x.shape}")
    B, T, D = x.shape
    H = w_hh.shape[1]

    Hp = _round_up(H, 128)                       # lane-align each gate block
    Bp = _round_up(B, 8)                         # sublane-align the batch
    Bblk = 128 if Bp > 128 else Bp               # batch block (parallel grid axis)
    Bp = _round_up(Bp, Bblk)
    Tc = min(T, 32) if time_chunk is None else int(time_chunk)
    n_chunks = pl.cdiv(T, Tc)
    T_pad = n_chunks * Tc

    # ---- hoisted input projection: one big (B*T, D) x (D, 4H) matmul ----------
    bias = (b_ih + b_hh).astype(jnp.float32)
    gx = x.reshape(B * T, D).astype(jnp.float32) @ w_ih.T.astype(jnp.float32) + bias
    gx = gx.reshape(B, T, 4, H)
    gx = jnp.pad(gx, ((0, Bp - B), (0, 0), (0, 0), (0, Hp - H)))
    gx = jnp.transpose(gx, (1, 0, 2, 3)).reshape(T, Bp, 4 * Hp)   # (T, Bp, 4*Hp)
    # Left-pad time with zeros: tanh(0)=0 keeps h=c=0 through the padded prefix.
    gx = jnp.pad(gx, ((T_pad - T, 0), (0, 0), (0, 0)))

    # ---- gate-padded W_hh^T: (Hp, 4*Hp), bf16 on the MXU path -----------------
    whh = w_hh.astype(jnp.float32).reshape(4, H, H)
    whh_p = jnp.zeros((4, Hp, Hp), jnp.float32).at[:, :H, :H].set(whh)
    whh_t = jnp.transpose(whh_p, (2, 0, 1)).reshape(Hp, 4 * Hp).astype(mxu_dtype)

    grid_spec = pltpu.PrefetchScalarGridSpec(
        num_scalar_prefetch=0,
        grid=(Bp // Bblk, n_chunks),             # (parallel batch, sequential time)
        in_specs=[
            pl.BlockSpec((Tc, Bblk, 4 * Hp), lambda bb, c: (c, bb, 0)),  # streamed
            pl.BlockSpec((Hp, 4 * Hp), lambda bb, c: (0, 0)),            # resident
        ],
        out_specs=pl.BlockSpec((Bblk, Hp), lambda bb, c: (bb, 0)),
        scratch_shapes=[
            pltpu.VMEM((Bblk, Hp), jnp.float32),   # h state
            pltpu.VMEM((Bblk, Hp), jnp.float32),   # c state
        ],
    )

    h_last = pl.pallas_call(
        _lstm_kernel,
        out_shape=jax.ShapeDtypeStruct((Bp, Hp), jnp.float32),
        grid_spec=grid_spec,
        compiler_params=pltpu.CompilerParams(
            dimension_semantics=("parallel", "arbitrary")),
    )(gx, whh_t)

    # Final Linear moved out of the kernel: runs once, XLA fuses it.
    h_last = h_last[:B, :H]
    return h_last @ w_fc.T.astype(jnp.float32) + b_fc.astype(jnp.float32)


def _reference_forward(x, w_ih, w_hh, b_ih, b_hh, w_fc, b_fc):
    """Pure-JAX reference matching torch.nn.LSTM + Linear semantics."""
    B, T, D = x.shape
    H = w_hh.shape[1]

    def step(carry, x_t):
        h, c = carry
        gates = x_t @ w_ih.T + b_ih + h @ w_hh.T + b_hh
        i = jax.nn.sigmoid(gates[:, 0 * H:1 * H])
        f = jax.nn.sigmoid(gates[:, 1 * H:2 * H])
        g = jnp.tanh(gates[:, 2 * H:3 * H])
        o = jax.nn.sigmoid(gates[:, 3 * H:4 * H])
        c = f * c + i * g
        h = o * jnp.tanh(c)
        return (h, c), None

    h0 = jnp.zeros((B, H), jnp.float32)
    c0 = jnp.zeros((B, H), jnp.float32)
    (h_last, _), _ = jax.lax.scan(step, (h0, c0), jnp.transpose(x, (1, 0, 2)))
    return h_last @ w_fc.T + b_fc


def _make_params(key, B, T, D, H, O):
    ks = jax.random.split(key, 7)
    scale = 1.0 / jnp.sqrt(jnp.float32(H))       # PyTorch default init range
    x = jax.random.normal(ks[0], (B, T, D), jnp.float32)
    w_ih = jax.random.uniform(ks[1], (4 * H, D), jnp.float32, -scale, scale)
    w_hh = jax.random.uniform(ks[2], (4 * H, H), jnp.float32, -scale, scale)
    b_ih = jax.random.uniform(ks[3], (4 * H,), jnp.float32, -scale, scale)
    b_hh = jax.random.uniform(ks[4], (4 * H,), jnp.float32, -scale, scale)
    w_fc = jax.random.uniform(ks[5], (O, H), jnp.float32, -scale, scale)
    b_fc = jax.random.uniform(ks[6], (O,), jnp.float32, -scale, scale)
    return x, w_ih, w_hh, b_ih, b_hh, w_fc, b_fc


if __name__ == "__main__":
    key = jax.random.PRNGKey(0)
    k1, k2 = jax.random.split(key)

    # Primary small shapes consistent with the module's forward (3D input B,T,D).
    B, T, D, H, O = 2, 8, 16, 32, 8
    params = _make_params(k1, B, T, D, H, O)

    # f32 MXU path: tight check vs reference.
    out_f32 = jax.block_until_ready(
        lstm_model_forward(*params, mxu_dtype=jnp.float32))
    ref = _reference_forward(*params)
    assert out_f32.shape == (B, O)
    assert jnp.allclose(out_f32, ref, atol=2e-5, rtol=1e-5), "f32 mismatch vs reference"

    # bf16 MXU-operand path (v6e/v7x-preferred): looser tolerance.
    out_bf16 = jax.block_until_ready(
        lstm_model_forward(*params, mxu_dtype=jnp.bfloat16))
    assert jnp.allclose(out_bf16, ref, atol=2e-2, rtol=2e-2), "bf16 mismatch vs reference"

    # Secondary shape exercising batch padding + time chunking / left-padding.
    B2, T2 = 3, 40
    params2 = _make_params(k2, B2, T2, D, H, O)
    out2 = jax.block_until_ready(
        lstm_model_forward(*params2, mxu_dtype=jnp.float32))
    ref2 = _reference_forward(*params2)
    assert out2.shape == (B2, O)
    assert jnp.allclose(out2, ref2, atol=2e-5, rtol=1e-5), "chunked-path mismatch"

    print("KERNEL_OK")
</pallas_src>

<mosaic_0001>
module attributes {stable_mosaic.version = 11 : i64} {
  func.func @_lstm_kernel(%arg0: i32, %arg1: i32, %arg2: memref<8x8x512xf32, #tpu.memory_space<vmem>>, %arg3: memref<128x512xf32, #tpu.memory_space<vmem>>, %arg4: memref<8x128xf32, #tpu.memory_space<vmem>>, %arg5: memref<8x128xf32, #tpu.memory_space<vmem>>, %arg6: memref<8x128xf32, #tpu.memory_space<vmem>>) attributes {dimension_semantics = [#tpu.dimension_semantics<parallel>, #tpu.dimension_semantics<arbitrary>], iteration_bounds = array<i64: 1, 1>, scalar_prefetch = 0 : i64, scratch_operands = 2 : i64, tpu.core_type = #tpu.core_type<tc>, window_params = [{transform_indices = @transform_0, window_bounds = array<i64: 8, 8, 512>}, {pipeline_mode = #tpu.pipeline_mode<synchronous>, transform_indices = @transform_1, window_bounds = array<i64: 128, 512>}, {transform_indices = @transform_2, window_bounds = array<i64: 8, 128>}]} {
    %c0_i32 = arith.constant 0 : i32
    %0 = arith.cmpi eq, %arg1, %c0_i32 : i32
    %1 = arith.extui %0 : i1 to i32
    %c0_i32_0 = arith.constant 0 : i32
    %2 = arith.cmpi ne, %1, %c0_i32_0 : i32
    scf.if %2 {
      %cst_108 = arith.constant 0.000000e+00 : f32
      %299 = vector.broadcast %cst_108 : f32 to vector<8x128xf32>
      %c0_109 = arith.constant 0 : index
      %c0_110 = arith.constant 0 : index
      %300 = vector.load %arg5[%c0_109, %c0_110] : memref<8x128xf32, #tpu.memory_space<vmem>>, vector<8x128xf32>
      tpu.vector_store %arg5[%c0_109, %c0_110], %299 {strides = array<i32>} : memref<8x128xf32, #tpu.memory_space<vmem>>, vector<8x128xf32>,
      %cst_111 = arith.constant 0.000000e+00 : f32
      %301 = vector.broadcast %cst_111 : f32 to vector<8x128xf32>
      %c0_112 = arith.constant 0 : index
      %c0_113 = arith.constant 0 : index
      %302 = vector.load %arg6[%c0_112, %c0_113] : memref<8x128xf32, #tpu.memory_space<vmem>>, vector<8x128xf32>
      tpu.vector_store %arg6[%c0_112, %c0_113], %301 {strides = array<i32>} : memref<8x128xf32, #tpu.memory_space<vmem>>, vector<8x128xf32>,
    } else {
    }
    %c0 = arith.constant 0 : index
    %c0_1 = arith.constant 0 : index
    %3 = vector.load %arg3[%c0, %c0_1] : memref<128x512xf32, #tpu.memory_space<vmem>>, vector<128x512xf32>
    %c0_2 = arith.constant 0 : index
    %c0_3 = arith.constant 0 : index
    %4 = vector.load %arg5[%c0_2, %c0_3] : memref<8x128xf32, #tpu.memory_space<vmem>>, vector<8x128xf32>
    %c0_4 = arith.constant 0 : index
    %c0_5 = arith.constant 0 : index
    %5 = vector.load %arg6[%c0_4, %c0_5] : memref<8x128xf32, #tpu.memory_space<vmem>>, vector<8x128xf32>
    %c0_i32_6 = arith.constant 0 : i32
    %6 = arith.index_cast %c0_i32_6 : i32 to index
    %c0_7 = arith.constant 0 : index
    %c0_8 = arith.constant 0 : index
    %7 = vector.load %arg2[%6, %c0_7, %c0_8] : memref<8x8x512xf32, #tpu.memory_space<vmem>>, vector<1x8x512xf32>
    %8 = vector.shape_cast %7 : vector<1x8x512xf32> to vector<8x512xf32>
    %cst = arith.constant dense<0.000000e+00> : vector<8x512xf32>
    %9 = tpu.matmul %4, %3, %cst {dimension_numbers = #tpu.dot_dimension_numbers<[1], [0], [0], [1], [0, 0, 1, 1], [], []>} : vector<8x128xf32>, vector<128x512xf32>, vector<8x512xf32> -> vector<8x512xf32>
    %10 = arith.addf %8, %9 : vector<8x512xf32>
    %11 = vector.extract_strided_slice %10 {offsets = [0, 0], sizes = [8, 128], strides = [1, 1]} : vector<8x512xf32> to vector<8x128xf32>
    %cst_9 = arith.constant 5.000000e-01 : f32
    %12 = vector.broadcast %cst_9 : f32 to vector<8x128xf32>
    %13 = arith.mulf %12, %11 : vector<8x128xf32>
    %14 = math.tanh %13 : vector<8x128xf32>
    %cst_10 = arith.constant 5.000000e-01 : f32
    %15 = vector.broadcast %cst_10 : f32 to vector<8x128xf32>
    %16 = arith.mulf %15, %14 : vector<8x128xf32>
    %cst_11 = arith.constant 5.000000e-01 : f32
    %17 = vector.broadcast %cst_11 : f32 to vector<8x128xf32>
    %18 = arith.addf %16, %17 : vector<8x128xf32>
    %19 = vector.extract_strided_slice %10 {offsets = [0, 128], sizes = [8, 128], strides = [1, 1]} : vector<8x512xf32> to vector<8x128xf32>
    %cst_12 = arith.constant 5.000000e-01 : f32
    %20 = vector.broadcast %cst_12 : f32 to vector<8x128xf32>
    %21 = arith.mulf %20, %19 : vector<8x128xf32>
    %22 = math.tanh %21 : vector<8x128xf32>
    %cst_13 = arith.constant 5.000000e-01 : f32
    %23 = vector.broadcast %cst_13 : f32 to vector<8x128xf32>
    %24 = arith.mulf %23, %22 : vector<8x128xf32>
    %cst_14 = arith.constant 5.000000e-01 : f32
    %25 = vector.broadcast %cst_14 : f32 to vector<8x128xf32>
    %26 = arith.addf %24, %25 : vector<8x128xf32>
    %27 = vector.extract_strided_slice %10 {offsets = [0, 256], sizes = [8, 128], strides = [1, 1]} : vector<8x512xf32> to vector<8x128xf32>
    %28 = math.tanh %27 : vector<8x128xf32>
    %29 = vector.extract_strided_slice %10 {offsets = [0, 384], sizes = [8, 128], strides = [1, 1]} : vector<8x512xf32> to vector<8x128xf32>
    %cst_15 = arith.constant 5.000000e-01 : f32
    %30 = vector.broadcast %cst_15 : f32 to vector<8x128xf32>
    %31 = arith.mulf %30, %29 : vector<8x128xf32>
    %32 = math.tanh %31 : vector<8x128xf32>
    %cst_16 = arith.constant 5.000000e-01 : f32
    %33 = vector.broadcast %cst_16 : f32 to vector<8x128xf32>
    %34 = arith.mulf %33, %32 : vector<8x128xf32>
    %cst_17 = arith.constant 5.000000e-01 : f32
    %35 = vector.broadcast %cst_17 : f32 to vector<8x128xf32>
    %36 = arith.addf %34, %35 : vector<8x128xf32>
    %37 = arith.mulf %26, %5 : vector<8x128xf32>
    %38 = arith.mulf %18, %28 : vector<8x128xf32>
    %39 = arith.addf %37, %38 : vector<8x128xf32>
    %40 = math.tanh %39 : vector<8x128xf32>
    %41 = arith.mulf %36, %40 : vector<8x128xf32>
    %c1_i32 = arith.constant 1 : i32
    %42 = arith.index_cast %c1_i32 : i32 to index
    %c0_18 = arith.constant 0 : index
    %c0_19 = arith.constant 0 : index
    %43 = vector.load %arg2[%42, %c0_18, %c0_19] : memref<8x8x512xf32, #tpu.memory_space<vmem>>, vector<1x8x512xf32>
    %44 = vector.shape_cast %43 : vector<1x8x512xf32> to vector<8x512xf32>
    %cst_20 = arith.constant dense<0.000000e+00> : vector<8x512xf32>
    %45 = tpu.matmul %41, %3, %cst_20 {dimension_numbers = #tpu.dot_dimension_numbers<[1], [0], [0], [1], [0, 0, 1, 1], [], []>} : vector<8x128xf32>, vector<128x512xf32>, vector<8x512xf32> -> vector<8x512xf32>
    %46 = arith.addf %44, %45 : vector<8x512xf32>
    %47 = vector.extract_strided_slice %46 {offsets = [0, 0], sizes = [8, 128], strides = [1, 1]} : vector<8x512xf32> to vector<8x128xf32>
    %cst_21 = arith.constant 5.000000e-01 : f32
    %48 = vector.broadcast %cst_21 : f32 to vector<8x128xf32>
    %49 = arith.mulf %48, %47 : vector<8x128xf32>
    %50 = math.tanh %49 : vector<8x128xf32>
    %cst_22 = arith.constant 5.000000e-01 : f32
    %51 = vector.broadcast %cst_22 : f32 to vector<8x128xf32>
    %52 = arith.mulf %51, %50 : vector<8x128xf32>
    %cst_23 = arith.constant 5.000000e-01 : f32
    %53 = vector.broadcast %cst_23 : f32 to vector<8x128xf32>
    %54 = arith.addf %52, %53 : vector<8x128xf32>
    %55 = vector.extract_strided_slice %46 {offsets = [0, 128], sizes = [8, 128], strides = [1, 1]} : vector<8x512xf32> to vector<8x128xf32>
    %cst_24 = arith.constant 5.000000e-01 : f32
    %56 = vector.broadcast %cst_24 : f32 to vector<8x128xf32>
    %57 = arith.mulf %56, %55 : vector<8x128xf32>
    %58 = math.tanh %57 : vector<8x128xf32>
    %cst_25 = arith.constant 5.000000e-01 : f32
    %59 = vector.broadcast %cst_25 : f32 to vector<8x128xf32>
    %60 = arith.mulf %59, %58 : vector<8x128xf32>
    %cst_26 = arith.constant 5.000000e-01 : f32
    %61 = vector.broadcast %cst_26 : f32 to vector<8x128xf32>
    %62 = arith.addf %60, %61 : vector<8x128xf32>
    %63 = vector.extract_strided_slice %46 {offsets = [0, 256], sizes = [8, 128], strides = [1, 1]} : vector<8x512xf32> to vector<8x128xf32>
    %64 = math.tanh %63 : vector<8x128xf32>
    %65 = vector.extract_strided_slice %46 {offsets = [0, 384], sizes = [8, 128], strides = [1, 1]} : vector<8x512xf32> to vector<8x128xf32>
    %cst_27 = arith.constant 5.000000e-01 : f32
    %66 = vector.broadcast %cst_27 : f32 to vector<8x128xf32>
    %67 = arith.mulf %66, %65 : vector<8x128xf32>
    %68 = math.tanh %67 : vector<8x128xf32>
    %cst_28 = arith.constant 5.000000e-01 : f32
    %69 = vector.broadcast %cst_28 : f32 to vector<8x128xf32>
    %70 = arith.mulf %69, %68 : vector<8x128xf32>
    %cst_29 = arith.constant 5.000000e-01 : f32
    %71 = vector.broadcast %cst_29 : f32 to vector<8x128xf32>
    %72 = arith.addf %70, %71 : vector<8x128xf32>
    %73 = arith.mulf %62, %39 : vector<8x128xf32>
    %74 = arith.mulf %54, %64 : vector<8x128xf32>
    %75 = arith.addf %73, %74 : vector<8x128xf32>
    %76 = math.tanh %75 : vector<8x128xf32>
    %77 = arith.mulf %72, %76 : vector<8x128xf32>
    %c2_i32 = arith.constant 2 : i32
    %78 = arith.index_cast %c2_i32 : i32 to index
    %c0_30 = arith.constant 0 : index
    %c0_31 = arith.constant 0 : index
    %79 = vector.load %arg2[%78, %c0_30, %c0_31] : memref<8x8x512xf32, #tpu.memory_space<vmem>>, vector<1x8x512xf32>
    %80 = vector.shape_cast %79 : vector<1x8x512xf32> to vector<8x512xf32>
    %cst_32 = arith.constant dense<0.000000e+00> : vector<8x512xf32>
    %81 = tpu.matmul %77, %3, %cst_32 {dimension_numbers = #tpu.dot_dimension_numbers<[1], [0], [0], [1], [0, 0, 1, 1], [], []>} : vector<8x128xf32>, vector<128x512xf32>, vector<8x512xf32> -> vector<8x512xf32>
    %82 = arith.addf %80, %81 : vector<8x512xf32>
    %83 = vector.extract_strided_slice %82 {offsets = [0, 0], sizes = [8, 128], strides = [1, 1]} : vector<8x512xf32> to vector<8x128xf32>
    %cst_33 = arith.constant 5.000000e-01 : f32
    %84 = vector.broadcast %cst_33 : f32 to vector<8x128xf32>
    %85 = arith.mulf %84, %83 : vector<8x128xf32>
    %86 = math.tanh %85 : vector<8x128xf32>
    %cst_34 = arith.constant 5.000000e-01 : f32
    %87 = vector.broadcast %cst_34 : f32 to vector<8x128xf32>
    %88 = arith.mulf %87, %86 : vector<8x128xf32>
    %cst_35 = arith.constant 5.000000e-01 : f32
    %89 = vector.broadcast %cst_35 : f32 to vector<8x128xf32>
    %90 = arith.addf %88, %89 : vector<8x128xf32>
    %91 = vector.extract_strided_slice %82 {offsets = [0, 128], sizes = [8, 128], strides = [1, 1]} : vector<8x512xf32> to vector<8x128xf32>
    %cst_36 = arith.constant 5.000000e-01 : f32
    %92 = vector.broadcast %cst_36 : f32 to vector<8x128xf32>
    %93 = arith.mulf %92, %91 : vector<8x128xf32>
    %94 = math.tanh %93 : vector<8x128xf32>
    %cst_37 = arith.constant 5.000000e-01 : f32
    %95 = vector.broadcast %cst_37 : f32 to vector<8x128xf32>
    %96 = arith.mulf %95, %94 : vector<8x128xf32>
    %cst_38 = arith.constant 5.000000e-01 : f32
    %97 = vector.broadcast %cst_38 : f32 to vector<8x128xf32>
    %98 = arith.addf %96, %97 : vector<8x128xf32>
    %99 = vector.extract_strided_slice %82 {offsets = [0, 256], sizes = [8, 128], strides = [1, 1]} : vector<8x512xf32> to vector<8x128xf32>
    %100 = math.tanh %99 : vector<8x128xf32>
    %101 = vector.extract_strided_slice %82 {offsets = [0, 384], sizes = [8, 128], strides = [1, 1]} : vector<8x512xf32> to vector<8x128xf32>
    %cst_39 = arith.constant 5.000000e-01 : f32
    %102 = vector.broadcast %cst_39 : f32 to vector<8x128xf32>
    %103 = arith.mulf %102, %101 : vector<8x128xf32>
    %104 = math.tanh %103 : vector<8x128xf32>
    %cst_40 = arith.constant 5.000000e-01 : f32
    %105 = vector.broadcast %cst_40 : f32 to vector<8x128xf32>
    %106 = arith.mulf %105, %104 : vector<8x128xf32>
    %cst_41 = arith.constant 5.000000e-01 : f32
    %107 = vector.broadcast %cst_41 : f32 to vector<8x128xf32>
    %108 = arith.addf %106, %107 : vector<8x128xf32>
    %109 = arith.mulf %98, %75 : vector<8x128xf32>
    %110 = arith.mulf %90, %100 : vector<8x128xf32>
    %111 = arith.addf %109, %110 : vector<8x128xf32>
    %112 = math.tanh %111 : vector<8x128xf32>
    %113 = arith.mulf %108, %112 : vector<8x128xf32>
    %c3_i32 = arith.constant 3 : i32
    %114 = arith.index_cast %c3_i32 : i32 to index
    %c0_42 = arith.constant 0 : index
    %c0_43 = arith.constant 0 : index
    %115 = vector.load %arg2[%114, %c0_42, %c0_43] : memref<8x8x512xf32, #tpu.memory_space<vmem>>, vector<1x8x512xf32>
    %116 = vector.shape_cast %115 : vector<1x8x512xf32> to vector<8x512xf32>
    %cst_44 = arith.constant dense<0.000000e+00> : vector<8x512xf32>
    %117 = tpu.matmul %113, %3, %cst_44 {dimension_numbers = #tpu.dot_dimension_numbers<[1], [0], [0], [1], [0, 0, 1, 1], [], []>} : vector<8x128xf32>, vector<128x512xf32>, vector<8x512xf32> -> vector<8x512xf32>
    %118 = arith.addf %116, %117 : vector<8x512xf32>
    %119 = vector.extract_strided_slice %118 {offsets = [0, 0], sizes = [8, 128], strides = [1, 1]} : vector<8x512xf32> to vector<8x128xf32>
    %cst_45 = arith.constant 5.000000e-01 : f32
    %120 = vector.broadcast %cst_45 : f32 to vector<8x128xf32>
    %121 = arith.mulf %120, %119 : vector<8x128xf32>
    %122 = math.tanh %121 : vector<8x128xf32>
    %cst_46 = arith.constant 5.000000e-01 : f32
    %123 = vector.broadcast %cst_46 : f32 to vector<8x128xf32>
    %124 = arith.mulf %123, %122 : vector<8x128xf32>
    %cst_47 = arith.constant 5.000000e-01 : f32
    %125 = vector.broadcast %cst_47 : f32 to vector<8x128xf32>
    %126 = arith.addf %124, %125 : vector<8x128xf32>
    %127 = vector.extract_strided_slice %118 {offsets = [0, 128], sizes = [8, 128], strides = [1, 1]} : vector<8x512xf32> to vector<8x128xf32>
    %cst_48 = arith.constant 5.000000e-01 : f32
    %128 = vector.broadcast %cst_48 : f32 to vector<8x128xf32>
    %129 = arith.mulf %128, %127 : vector<8x128xf32>
    %130 = math.tanh %129 : vector<8x128xf32>
    %cst_49 = arith.constant 5.000000e-01 : f32
    %131 = vector.broadcast %cst_49 : f32 to vector<8x128xf32>
    %132 = arith.mulf %131, %130 : vector<8x128xf32>
    %cst_50 = arith.constant 5.000000e-01 : f32
    %133 = vector.broadcast %cst_50 : f32 to vector<8x128xf32>
    %134 = arith.addf %132, %133 : vector<8x128xf32>
    %135 = vector.extract_strided_slice %118 {offsets = [0, 256], sizes = [8, 128], strides = [1, 1]} : vector<8x512xf32> to vector<8x128xf32>
    %136 = math.tanh %135 : vector<8x128xf32>
    %137 = vector.extract_strided_slice %118 {offsets = [0, 384], sizes = [8, 128], strides = [1, 1]} : vector<8x512xf32> to vector<8x128xf32>
    %cst_51 = arith.constant 5.000000e-01 : f32
    %138 = vector.broadcast %cst_51 : f32 to vector<8x128xf32>
    %139 = arith.mulf %138, %137 : vector<8x128xf32>
    %140 = math.tanh %139 : vector<8x128xf32>
    %cst_52 = arith.constant 5.000000e-01 : f32
    %141 = vector.broadcast %cst_52 : f32 to vector<8x128xf32>
    %142 = arith.mulf %141, %140 : vector<8x128xf32>
    %cst_53 = arith.constant 5.000000e-01 : f32
    %143 = vector.broadcast %cst_53 : f32 to vector<8x128xf32>
    %144 = arith.addf %142, %143 : vector<8x128xf32>
    %145 = arith.mulf %134, %111 : vector<8x128xf32>
    %146 = arith.mulf %126, %136 : vector<8x128xf32>
    %147 = arith.addf %145, %146 : vector<8x128xf32>
    %148 = math.tanh %147 : vector<8x128xf32>
    %149 = arith.mulf %144, %148 : vector<8x128xf32>
    %c4_i32 = arith.constant 4 : i32
    %150 = arith.index_cast %c4_i32 : i32 to index
    %c0_54 = arith.constant 0 : index
    %c0_55 = arith.constant 0 : index
    %151 = vector.load %arg2[%150, %c0_54, %c0_55] : memref<8x8x512xf32, #tpu.memory_space<vmem>>, vector<1x8x512xf32>
    %152 = vector.shape_cast %151 : vector<1x8x512xf32> to vector<8x512xf32>
    %cst_56 = arith.constant dense<0.000000e+00> : vector<8x512xf32>
    %153 = tpu.matmul %149, %3, %cst_56 {dimension_numbers = #tpu.dot_dimension_numbers<[1], [0], [0], [1], [0, 0, 1, 1], [], []>} : vector<8x128xf32>, vector<128x512xf32>, vector<8x512xf32> -> vector<8x512xf32>
    %154 = arith.addf %152, %153 : vector<8x512xf32>
    %155 = vector.extract_strided_slice %154 {offsets = [0, 0], sizes = [8, 128], strides = [1, 1]} : vector<8x512xf32> to vector<8x128xf32>
    %cst_57 = arith.constant 5.000000e-01 : f32
    %156 = vector.broadcast %cst_57 : f32 to vector<8x128xf32>
    %157 = arith.mulf %156, %155 : vector<8x128xf32>
    %158 = math.tanh %157 : vector<8x128xf32>
    %cst_58 = arith.constant 5.000000e-01 : f32
    %159 = vector.broadcast %cst_58 : f32 to vector<8x128xf32>
    %160 = arith.mulf %159, %158 : vector<8x128xf32>
    %cst_59 = arith.constant 5.000000e-01 : f32
    %161 = vector.broadcast %cst_59 : f32 to vector<8x128xf32>
    %162 = arith.addf %160, %161 : vector<8x128xf32>
    %163 = vector.extract_strided_slice %154 {offsets = [0, 128], sizes = [8, 128], strides = [1, 1]} : vector<8x512xf32> to vector<8x128xf32>
    %cst_60 = arith.constant 5.000000e-01 : f32
    %164 = vector.broadcast %cst_60 : f32 to vector<8x128xf32>
    %165 = arith.mulf %164, %163 : vector<8x128xf32>
    %166 = math.tanh %165 : vector<8x128xf32>
    %cst_61 = arith.constant 5.000000e-01 : f32
    %167 = vector.broadcast %cst_61 : f32 to vector<8x128xf32>
    %168 = arith.mulf %167, %166 : vector<8x128xf32>
    %cst_62 = arith.constant 5.000000e-01 : f32
    %169 = vector.broadcast %cst_62 : f32 to vector<8x128xf32>
    %170 = arith.addf %168, %169 : vector<8x128xf32>
    %171 = vector.extract_strided_slice %154 {offsets = [0, 256], sizes = [8, 128], strides = [1, 1]} : vector<8x512xf32> to vector<8x128xf32>
    %172 = math.tanh %171 : vector<8x128xf32>
    %173 = vector.extract_strided_slice %154 {offsets = [0, 384], sizes = [8, 128], strides = [1, 1]} : vector<8x512xf32> to vector<8x128xf32>
    %cst_63 = arith.constant 5.000000e-01 : f32
    %174 = vector.broadcast %cst_63 : f32 to vector<8x128xf32>
    %175 = arith.mulf %174, %173 : vector<8x128xf32>
    %176 = math.tanh %175 : vector<8x128xf32>
    %cst_64 = arith.constant 5.000000e-01 : f32
    %177 = vector.broadcast %cst_64 : f32 to vector<8x128xf32>
    %178 = arith.mulf %177, %176 : vector<8x128xf32>
    %cst_65 = arith.constant 5.000000e-01 : f32
    %179 = vector.broadcast %cst_65 : f32 to vector<8x128xf32>
    %180 = arith.addf %178, %179 : vector<8x128xf32>
    %181 = arith.mulf %170, %147 : vector<8x128xf32>
    %182 = arith.mulf %162, %172 : vector<8x128xf32>
    %183 = arith.addf %181, %182 : vector<8x128xf32>
    %184 = math.tanh %183 : vector<8x128xf32>
    %185 = arith.mulf %180, %184 : vector<8x128xf32>
    %c5_i32 = arith.constant 5 : i32
    %186 = arith.index_cast %c5_i32 : i32 to index
    %c0_66 = arith.constant 0 : index
    %c0_67 = arith.constant 0 : index
    %187 = vector.load %arg2[%186, %c0_66, %c0_67] : memref<8x8x512xf32, #tpu.memory_space<vmem>>, vector<1x8x512xf32>
    %188 = vector.shape_cast %187 : vector<1x8x512xf32> to vector<8x512xf32>
    %cst_68 = arith.constant dense<0.000000e+00> : vector<8x512xf32>
    %189 = tpu.matmul %185, %3, %cst_68 {dimension_numbers = #tpu.dot_dimension_numbers<[1], [0], [0], [1], [0, 0, 1, 1], [], []>} : vector<8x128xf32>, vector<128x512xf32>, vector<8x512xf32> -> vector<8x512xf32>
    %190 = arith.addf %188, %189 : vector<8x512xf32>
    %191 = vector.extract_strided_slice %190 {offsets = [0, 0], sizes = [8, 128], strides = [1, 1]} : vector<8x512xf32> to vector<8x128xf32>
    %cst_69 = arith.constant 5.000000e-01 : f32
    %192 = vector.broadcast %cst_69 : f32 to vector<8x128xf32>
    %193 = arith.mulf %192, %191 : vector<8x128xf32>
    %194 = math.tanh %193 : vector<8x128xf32>
    %cst_70 = arith.constant 5.000000e-01 : f32
    %195 = vector.broadcast %cst_70 : f32 to vector<8x128xf32>
    %196 = arith.mulf %195, %194 : vector<8x128xf32>
    %cst_71 = arith.constant 5.000000e-01 : f32
    %197 = vector.broadcast %cst_71 : f32 to vector<8x128xf32>
    %198 = arith.addf %196, %197 : vector<8x128xf32>
    %199 = vector.extract_strided_slice %190 {offsets = [0, 128], sizes = [8, 128], strides = [1, 1]} : vector<8x512xf32> to vector<8x128xf32>
    %cst_72 = arith.constant 5.000000e-01 : f32
    %200 = vector.broadcast %cst_72 : f32 to vector<8x128xf32>
    %201 = arith.mulf %200, %199 : vector<8x128xf32>
    %202 = math.tanh %201 : vector<8x128xf32>
    %cst_73 = arith.constant 5.000000e-01 : f32
    %203 = vector.broadcast %cst_73 : f32 to vector<8x128xf32>
    %204 = arith.mulf %203, %202 : vector<8x128xf32>
    %cst_74 = arith.constant 5.000000e-01 : f32
    %205 = vector.broadcast %cst_74 : f32 to vector<8x128xf32>
    %206 = arith.addf %204, %205 : vector<8x128xf32>
    %207 = vector.extract_strided_slice %190 {offsets = [0, 256], sizes = [8, 128], strides = [1, 1]} : vector<8x512xf32> to vector<8x128xf32>
    %208 = math.tanh %207 : vector<8x128xf32>
    %209 = vector.extract_strided_slice %190 {offsets = [0, 384], sizes = [8, 128], strides = [1, 1]} : vector<8x512xf32> to vector<8x128xf32>
    %cst_75 = arith.constant 5.000000e-01 : f32
    %210 = vector.broadcast %cst_75 : f32 to vector<8x128xf32>
    %211 = arith.mulf %210, %209 : vector<8x128xf32>
    %212 = math.tanh %211 : vector<8x128xf32>
    %cst_76 = arith.constant 5.000000e-01 : f32
    %213 = vector.broadcast %cst_76 : f32 to vector<8x128xf32>
    %214 = arith.mulf %213, %212 : vector<8x128xf32>
    %cst_77 = arith.constant 5.000000e-01 : f32
    %215 = vector.broadcast %cst_77 : f32 to vector<8x128xf32>
    %216 = arith.addf %214, %215 : vector<8x128xf32>
    %217 = arith.mulf %206, %183 : vector<8x128xf32>
    %218 = arith.mulf %198, %208 : vector<8x128xf32>
    %219 = arith.addf %217, %218 : vector<8x128xf32>
    %220 = math.tanh %219 : vector<8x128xf32>
    %221 = arith.mulf %216, %220 : vector<8x128xf32>
    %c6_i32 = arith.constant 6 : i32
    %222 = arith.index_cast %c6_i32 : i32 to index
    %c0_78 = arith.constant 0 : index
    %c0_79 = arith.constant 0 : index
    %223 = vector.load %arg2[%222, %c0_78, %c0_79] : memref<8x8x512xf32, #tpu.memory_space<vmem>>, vector<1x8x512xf32>
    %224 = vector.shape_cast %223 : vector<1x8x512xf32> to vector<8x512xf32>
    %cst_80 = arith.constant dense<0.000000e+00> : vector<8x512xf32>
    %225 = tpu.matmul %221, %3, %cst_80 {dimension_numbers = #tpu.dot_dimension_numbers<[1], [0], [0], [1], [0, 0, 1, 1], [], []>} : vector<8x128xf32>, vector<128x512xf32>, vector<8x512xf32> -> vector<8x512xf32>
    %226 = arith.addf %224, %225 : vector<8x512xf32>
    %227 = vector.extract_strided_slice %226 {offsets = [0, 0], sizes = [8, 128], strides = [1, 1]} : vector<8x512xf32> to vector<8x128xf32>
    %cst_81 = arith.constant 5.000000e-01 : f32
    %228 = vector.broadcast %cst_81 : f32 to vector<8x128xf32>
    %229 = arith.mulf %228, %227 : vector<8x128xf32>
    %230 = math.tanh %229 : vector<8x128xf32>
    %cst_82 = arith.constant 5.000000e-01 : f32
    %231 = vector.broadcast %cst_82 : f32 to vector<8x128xf32>
    %232 = arith.mulf %231, %230 : vector<8x128xf32>
    %cst_83 = arith.constant 5.000000e-01 : f32
    %233 = vector.broadcast %cst_83 : f32 to vector<8x128xf32>
    %234 = arith.addf %232, %233 : vector<8x128xf32>
    %235 = vector.extract_strided_slice %226 {offsets = [0, 128], sizes = [8, 128], strides = [1, 1]} : vector<8x512xf32> to vector<8x128xf32>
    %cst_84 = arith.constant 5.000000e-01 : f32
    %236 = vector.broadcast %cst_84 : f32 to vector<8x128xf32>
    %237 = arith.mulf %236, %235 : vector<8x128xf32>
    %238 = math.tanh %237 : vector<8x128xf32>
    %cst_85 = arith.constant 5.000000e-01 : f32
    %239 = vector.broadcast %cst_85 : f32 to vector<8x128xf32>
    %240 = arith.mulf %239, %238 : vector<8x128xf32>
    %cst_86 = arith.constant 5.000000e-01 : f32
    %241 = vector.broadcast %cst_86 : f32 to vector<8x128xf32>
    %242 = arith.addf %240, %241 : vector<8x128xf32>
    %243 = vector.extract_strided_slice %226 {offsets = [0, 256], sizes = [8, 128], strides = [1, 1]} : vector<8x512xf32> to vector<8x128xf32>
    %244 = math.tanh %243 : vector<8x128xf32>
    %245 = vector.extract_strided_slice %226 {offsets = [0, 384], sizes = [8, 128], strides = [1, 1]} : vector<8x512xf32> to vector<8x128xf32>
    %cst_87 = arith.constant 5.000000e-01 : f32
    %246 = vector.broadcast %cst_87 : f32 to vector<8x128xf32>
    %247 = arith.mulf %246, %245 : vector<8x128xf32>
    %248 = math.tanh %247 : vector<8x128xf32>
    %cst_88 = arith.constant 5.000000e-01 : f32
    %249 = vector.broadcast %cst_88 : f32 to vector<8x128xf32>
    %250 = arith.mulf %249, %248 : vector<8x128xf32>
    %cst_89 = arith.constant 5.000000e-01 : f32
    %251 = vector.broadcast %cst_89 : f32 to vector<8x128xf32>
    %252 = arith.addf %250, %251 : vector<8x128xf32>
    %253 = arith.mulf %242, %219 : vector<8x128xf32>
    %254 = arith.mulf %234, %244 : vector<8x128xf32>
    %255 = arith.addf %253, %254 : vector<8x128xf32>
    %256 = math.tanh %255 : vector<8x128xf32>
    %257 = arith.mulf %252, %256 : vector<8x128xf32>
    %c7_i32 = arith.constant 7 : i32
    %258 = arith.index_cast %c7_i32 : i32 to index
    %c0_90 = arith.constant 0 : index
    %c0_91 = arith.constant 0 : index
    %259 = vector.load %arg2[%258, %c0_90, %c0_91] : memref<8x8x512xf32, #tpu.memory_space<vmem>>, vector<1x8x512xf32>
    %260 = vector.shape_cast %259 : vector<1x8x512xf32> to vector<8x512xf32>
    %cst_92 = arith.constant dense<0.000000e+00> : vector<8x512xf32>
    %261 = tpu.matmul %257, %3, %cst_92 {dimension_numbers = #tpu.dot_dimension_numbers<[1], [0], [0], [1], [0, 0, 1, 1], [], []>} : vector<8x128xf32>, vector<128x512xf32>, vector<8x512xf32> -> vector<8x512xf32>
    %262 = arith.addf %260, %261 : vector<8x512xf32>
    %263 = vector.extract_strided_slice %262 {offsets = [0, 0], sizes = [8, 128], strides = [1, 1]} : vector<8x512xf32> to vector<8x128xf32>
    %cst_93 = arith.constant 5.000000e-01 : f32
    %264 = vector.broadcast %cst_93 : f32 to vector<8x128xf32>
    %265 = arith.mulf %264, %263 : vector<8x128xf32>
    %266 = math.tanh %265 : vector<8x128xf32>
    %cst_94 = arith.constant 5.000000e-01 : f32
    %267 = vector.broadcast %cst_94 : f32 to vector<8x128xf32>
    %268 = arith.mulf %267, %266 : vector<8x128xf32>
    %cst_95 = arith.constant 5.000000e-01 : f32
    %269 = vector.broadcast %cst_95 : f32 to vector<8x128xf32>
    %270 = arith.addf %268, %269 : vector<8x128xf32>
    %271 = vector.extract_strided_slice %262 {offsets = [0, 128], sizes = [8, 128], strides = [1, 1]} : vector<8x512xf32> to vector<8x128xf32>
    %cst_96 = arith.constant 5.000000e-01 : f32
    %272 = vector.broadcast %cst_96 : f32 to vector<8x128xf32>
    %273 = arith.mulf %272, %271 : vector<8x128xf32>
    %274 = math.tanh %273 : vector<8x128xf32>
    %cst_97 = arith.constant 5.000000e-01 : f32
    %275 = vector.broadcast %cst_97 : f32 to vector<8x128xf32>
    %276 = arith.mulf %275, %274 : vector<8x128xf32>
    %cst_98 = arith.constant 5.000000e-01 : f32
    %277 = vector.broadcast %cst_98 : f32 to vector<8x128xf32>
    %278 = arith.addf %276, %277 : vector<8x128xf32>
    %279 = vector.extract_strided_slice %262 {offsets = [0, 256], sizes = [8, 128], strides = [1, 1]} : vector<8x512xf32> to vector<8x128xf32>
    %280 = math.tanh %279 : vector<8x128xf32>
    %281 = vector.extract_strided_slice %262 {offsets = [0, 384], sizes = [8, 128], strides = [1, 1]} : vector<8x512xf32> to vector<8x128xf32>
    %cst_99 = arith.constant 5.000000e-01 : f32
    %282 = vector.broadcast %cst_99 : f32 to vector<8x128xf32>
    %283 = arith.mulf %282, %281 : vector<8x128xf32>
    %284 = math.tanh %283 : vector<8x128xf32>
    %cst_100 = arith.constant 5.000000e-01 : f32
    %285 = vector.broadcast %cst_100 : f32 to vector<8x128xf32>
    %286 = arith.mulf %285, %284 : vector<8x128xf32>
    %cst_101 = arith.constant 5.000000e-01 : f32
    %287 = vector.broadcast %cst_101 : f32 to vector<8x128xf32>
    %288 = arith.addf %286, %287 : vector<8x128xf32>
    %289 = arith.mulf %278, %255 : vector<8x128xf32>
    %290 = arith.mulf %270, %280 : vector<8x128xf32>
    %291 = arith.addf %289, %290 : vector<8x128xf32>
    %292 = math.tanh %291 : vector<8x128xf32>
    %293 = arith.mulf %288, %292 : vector<8x128xf32>
    %c8_i32 = arith.constant 8 : i32
    %c0_102 = arith.constant 0 : index
    %c0_103 = arith.constant 0 : index
    %294 = vector.load %arg5[%c0_102, %c0_103] : memref<8x128xf32, #tpu.memory_space<vmem>>, vector<8x128xf32>
    tpu.vector_store %arg5[%c0_102, %c0_103], %293 {strides = array<i32>} : memref<8x128xf32, #tpu.memory_space<vmem>>, vector<8x128xf32>,
    %c0_104 = arith.constant 0 : index
    %c0_105 = arith.constant 0 : index
    %295 = vector.load %arg6[%c0_104, %c0_105] : memref<8x128xf32, #tpu.memory_space<vmem>>, vector<8x128xf32>
    tpu.vector_store %arg6[%c0_104, %c0_105], %291 {strides = array<i32>} : memref<8x128xf32, #tpu.memory_space<vmem>>, vector<8x128xf32>,
    %c0_i32_106 = arith.constant 0 : i32
    %296 = arith.cmpi eq, %arg1, %c0_i32_106 : i32
    %297 = arith.extui %296 : i1 to i32
    %c0_i32_107 = arith.constant 0 : i32
    %298 = arith.cmpi ne, %297, %c0_i32_107 : i32
    scf.if %298 {
      %c0_108 = arith.constant 0 : index
      %c0_109 = arith.constant 0 : index
      %299 = vector.load %arg4[%c0_108, %c0_109] : memref<8x128xf32, #tpu.memory_space<vmem>>, vector<8x128xf32>
      tpu.vector_store %arg4[%c0_108, %c0_109], %293 {strides = array<i32>} : memref<8x128xf32, #tpu.memory_space<vmem>>, vector<8x128xf32>,
    } else {
    }
    return
  }
  func.func @transform_0(%arg0: i32, %arg1: i32) -> (i32, i32, i32) {
    %c0_i32 = arith.constant 0 : i32
    %c0_i32_0 = arith.constant 0 : i32
    return %arg1, %arg0, %c0_i32 : i32, i32, i32
  }
  func.func @transform_1(%arg0: i32, %arg1: i32) -> (i32, i32) {
    %c0_i32 = arith.constant 0 : i32
    %c0_i32_0 = arith.constant 0 : i32
    %c0_i32_1 = arith.constant 0 : i32
    return %c0_i32, %c0_i32_0 : i32, i32
  }
  func.func @transform_2(%arg0: i32, %arg1: i32) -> (i32, i32) {
    %c0_i32 = arith.constant 0 : i32
    %c0_i32_0 = arith.constant 0 : i32
    return %arg0, %c0_i32 : i32, i32
  }
}

</mosaic_0001>

<bundles_post_ra>
// kernel: lstm_model_forward.1
= control target key start
LH: loop header
LB: loop body
LE: loop exit
PB: predicated region body
PF: predicated region fallthrough
CT: control target
= control target key end

     0   :  { %v2065_v3 = vmov 0.0   ;;  %s2734_s1 = inlined_call_operand.vmem [shape: f32[128,512], index: 1, kind: input, shape index: {}]   ;;  %s2735_s0 = inlined_call_operand.vmem [shape: f32[8,8,512], index: 0, kind: input, shape index: {}]   ;;  %s2736_s2 = inlined_call_operand.vmem [shape: f32[8,128], index: 2, kind: output, shape index: {}]  }
   0x1   :  { %v18_v0 = vld [vmem:[%s2734_s1 + $0x8] sm:$0xff]  ;;  %v17_v2 = vld [vmem:[%s2734_s1] sm:$0xff]  ;;  %151 = vmatprep.mubr.f32.mxu0 %v2065_v3  ;;  %222 = vmatprep.mubr.f32.mxu1 %v2065_v3  ;;  %v20_v12 = vld [vmem:[%s2734_s1 + $0x18] sm:$0xff] }
   0x2   :  { %v22_v1 = vld [vmem:[%s2734_s1 + $0x28] sm:$0xff]  ;;  %v21_v5 = vld [vmem:[%s2734_s1 + $0x20] sm:$0xff]  ;;  %v24_v13 = vld [vmem:[%s2734_s1 + $0x38] sm:$0xff] }
   0x3   :  { %v2092_v4 = vpack.c.bf16 %v22_v1, %v18_v0  ;;  %v26_v6 = vld [vmem:[%s2734_s1 + $0x48] sm:$0xff]  ;;  %v2103_v8 = vpack.c.bf16 %v21_v5, %v17_v2  ;;  %v25_v10 = vld [vmem:[%s2734_s1 + $0x40] sm:$0xff]  ;;  %v19_v14 = vld [vmem:[%s2734_s1 + $0x10] sm:$0xff]  ;;  %v2129_v17 = vpack.c.bf16 %v24_v13, %v20_v12 }
   0x4   :  { %v30_v7 = vld [vmem:[%s2734_s1 + $0x68] sm:$0xff]  ;;  %v29_v11 = vld [vmem:[%s2734_s1 + $0x60] sm:$0xff]  ;;  %v23_v15 = vld [vmem:[%s2734_s1 + $0x30] sm:$0xff] }
   0x5   :  { %v2105_v9 = vpack.c.bf16 %v30_v7, %v26_v6  ;;  %1473 = vmatprep.subr.bf16.mxu0 %v2092_v4  ;;  %v2127_v16 = vpack.c.bf16 %v29_v11, %v25_v10  ;;  %v2131_v18 = vpack.c.bf16 %v23_v15, %v19_v14  ;;  %v34_v19 = vld [vmem:[%s2734_s1 + $0x88] sm:$0xff]  ;;  %v33_v21 = vld [vmem:[%s2734_s1 + $0x80] sm:$0xff]  ;;  %v28_v24 = vld [vmem:[%s2734_s1 + $0x58] sm:$0xff]  ;;  %1505 = vmatprep.subr.bf16.mxu1 %v2129_v17 }
   0x6   :  { %1475 = vmatpush1.bf16.msra.mxu0 %v2103_v8  ;;  %v38_v20 = vld [vmem:[%s2734_s1 + $0xa8] sm:$0xff]  ;;  %v37_v23 = vld [vmem:[%s2734_s1 + $0xa0] sm:$0xff]  ;;  %v32_v25 = vld [vmem:[%s2734_s1 + $0x78] sm:$0xff] }
   0x7   :  { %1477 = vmatprep.subr.bf16.mxu0 %v2105_v9  ;;  %v2143_v22 = vpack.c.bf16 %v38_v20, %v34_v19  ;;  %v2155_v26 = vpack.c.bf16 %v32_v25, %v28_v24  ;;  %v27_v27 = vld [vmem:[%s2734_s1 + $0x50] sm:$0xff]  ;;  %v42_v29 = vld [vmem:[%s2734_s1 + $0xc8] sm:$0xff]  ;;  %1507 = vmatpush1.bf16.msra.mxu1 %v2131_v18  ;;  %v2173_v32 = vpack.c.bf16 %v37_v23, %v33_v21  ;;  %v36_v33 = vld [vmem:[%s2734_s1 + $0x98] sm:$0xff] }
   0x8   :  { %v31_v28 = vld [vmem:[%s2734_s1 + $0x70] sm:$0xff]  ;;  %v46_v31 = vld [vmem:[%s2734_s1 + $0xe8] sm:$0xff]  ;;  %v40_v34 = vld [vmem:[%s2734_s1 + $0xb8] sm:$0xff] }
   0x9   :  { %v2167_v30 = vpack.c.bf16 %v31_v28, %v27_v27  ;;  %1509 = vmatprep.subr.bf16.mxu1 %v2155_v26  ;;  %v35_v35 = vld [vmem:[%s2734_s1 + $0x90] sm:$0xff]  ;;  %v2186_v36 = vpack.c.bf16 %v46_v31, %v42_v29  ;;  %v41_v37 = vld [vmem:[%s2734_s1 + $0xc0] sm:$0xff]  ;;  %v2194_v39 = vpack.c.bf16 %v40_v34, %v36_v33  ;;  %v50_v41 = vld [vmem:[%s2734_s1 + $0x108] sm:$0xff] }
   0xa   :  { %1479 = vmatpush1.bf16.msra.mxu0 %v2127_v16  ;;  %v45_v38 = vld [vmem:[%s2734_s1 + $0xe0] sm:$0xff]  ;;  %v39_v40 = vld [vmem:[%s2734_s1 + $0xb0] sm:$0xff]  ;;  %v54_v42 = vld [vmem:[%s2734_s1 + $0x128] sm:$0xff] }
   0xb   :  { %1481 = vmatprep.subr.bf16.mxu0 %v2143_v22  ;;  %v44_v43 = vld [vmem:[%s2734_s1 + $0xd8] sm:$0xff]  ;;  %1511 = vmatpush1.bf16.msra.mxu1 %v2167_v30  ;;  %v2209_v44 = vpack.c.bf16 %v39_v40, %v35_v35  ;;  %v2215_v46 = vpack.c.bf16 %v45_v38, %v41_v37  ;;  %v49_v47 = vld [vmem:[%s2734_s1 + $0x100] sm:$0xff]  ;;  %v43_v49 = vld [vmem:[%s2734_s1 + $0xd0] sm:$0xff]  ;;  %v2230_v51 = vpack.c.bf16 %v54_v42, %v50_v41 }
   0xc   :  { %v48_v45 = vld [vmem:[%s2734_s1 + $0xf8] sm:$0xff]  ;;  %1513 = vmatprep.subr.bf16.mxu1 %v2194_v39  ;;  %v47_v50 = vld [vmem:[%s2734_s1 + $0xf0] sm:$0xff]  ;;  %v53_v52 = vld [vmem:[%s2734_s1 + $0x120] sm:$0xff] }
   0xd   :  { %v2221_v48 = vpack.c.bf16 %v48_v45, %v44_v43  ;;  %v52_v53 = vld [vmem:[%s2734_s1 + $0x118] sm:$0xff]  ;;  %v58_v55 = vld [vmem:[%s2734_s1 + $0x148] sm:$0xff]  ;;  %v2248_v57 = vpack.c.bf16 %v47_v50, %v43_v49  ;;  %v2251_v58 = vpack.c.bf16 %v53_v52, %v49_v47  ;;  %v57_v59 = vld [vmem:[%s2734_s1 + $0x140] sm:$0xff] }
   0xe   :  { %1483 = vmatpush1.bf16.msra.mxu0 %v2173_v32  ;;  %v56_v54 = vld [vmem:[%s2734_s1 + $0x138] sm:$0xff]  ;;  %v62_v56 = vld [vmem:[%s2734_s1 + $0x168] sm:$0xff]  ;;  %v51_v61 = vld [vmem:[%s2734_s1 + $0x110] sm:$0xff] }
   0xf   :  { %1485 = vmatprep.subr.bf16.mxu0 %v2186_v36  ;;  %1515 = vmatpush1.bf16.msra.mxu1 %v2209_v44  ;;  %v2257_v60 = vpack.c.bf16 %v56_v54, %v52_v53  ;;  %v55_v62 = vld [vmem:[%s2734_s1 + $0x130] sm:$0xff]  ;;  %v2266_v63 = vpack.c.bf16 %v62_v56, %v58_v55  ;;  %v61_v0 = vld [vmem:[%s2734_s1 + $0x160] sm:$0xff]  ;;  %v60_v1 = vld [vmem:[%s2734_s1 + $0x158] sm:$0xff] }
  0x10   :  { %1517 = vmatprep.subr.bf16.mxu1 %v2221_v48  ;;  %v64_v2 = vld [vmem:[%s2734_s1 + $0x178] sm:$0xff]  ;;  %v66_v5 = vld [vmem:[%s2734_s1 + $0x188] sm:$0xff]  ;;  %v2284_v7 = vpack.c.bf16 %v55_v62, %v51_v61  ;;  %v2287_v10 = vpack.c.bf16 %v61_v0, %v57_v59  ;;  %v65_v11 = vld [vmem:[%s2734_s1 + $0x180] sm:$0xff] }
  0x11   :  { %v70_v6 = vld [vmem:[%s2734_s1 + $0x1a8] sm:$0xff]  ;;  %v2293_v12 = vpack.c.bf16 %v64_v2, %v60_v1  ;;  %v59_v13 = vld [vmem:[%s2734_s1 + $0x150] sm:$0xff]  ;;  %v69_v19 = vld [vmem:[%s2734_s1 + $0x1a0] sm:$0xff] }
  0x12   :  { %1487 = vmatpush1.bf16.msra.mxu0 %v2215_v46  ;;  %v63_v14 = vld [vmem:[%s2734_s1 + $0x170] sm:$0xff]  ;;  %v2302_v15 = vpack.c.bf16 %v70_v6, %v66_v5  ;;  %v68_v20 = vld [vmem:[%s2734_s1 + $0x198] sm:$0xff]  ;;  %v74_v23 = vld [vmem:[%s2734_s1 + $0x1c8] sm:$0xff]  ;;  %v2323_v27 = vpack.c.bf16 %v69_v19, %v65_v11 }
  0x13   :  { %1489 = vmatprep.subr.bf16.mxu0 %v2230_v51  ;;  %1519 = vmatpush1.bf16.msra.mxu1 %v2248_v57  ;;  %v72_v21 = vld [vmem:[%s2734_s1 + $0x1b8] sm:$0xff]  ;;  %v78_v24 = vld [vmem:[%s2734_s1 + $0x1e8] sm:$0xff]  ;;  %v2320_v25 = vpack.c.bf16 %v63_v14, %v59_v13  ;;  %v73_v28 = vld [vmem:[%s2734_s1 + $0x1c0] sm:$0xff] }
  0x14   :  { %1521 = vmatprep.subr.bf16.mxu1 %v2257_v60  ;;  %v2329_v29 = vpack.c.bf16 %v72_v21, %v68_v20  ;;  %v67_v31 = vld [vmem:[%s2734_s1 + $0x190] sm:$0xff]  ;;  %v2338_v34 = vpack.c.bf16 %v78_v24, %v74_v23  ;;  %v77_v35 = vld [vmem:[%s2734_s1 + $0x1e0] sm:$0xff]  ;;  %v76_v37 = vld [vmem:[%s2734_s1 + $0x1d8] sm:$0xff] }
  0x15   :  { %v71_v33 = vld [vmem:[%s2734_s1 + $0x1b0] sm:$0xff]  ;;  %v80_v38 = vld [vmem:[%s2734_s1 + $0x1f8] sm:$0xff]  ;;  %v2353_v41 = vpack.c.bf16 %v77_v35, %v73_v28  ;;  %v83_v49 = vld [vmem:[%s2735_s0] sm:$0xff] }
  0x16   :  { %1491 = vmatpush1.bf16.msra.mxu0 %v2251_v58  ;;  %v2350_v40 = vpack.c.bf16 %v71_v33, %v67_v31  ;;  %v2356_v42 = vpack.c.bf16 %v80_v38, %v76_v37  ;;  %v75_v43 = vld [vmem:[%s2734_s1 + $0x1d0] sm:$0xff]  ;;  %v84_v50 = vld [vmem:[%s2735_s0 + $0x8] sm:$0xff]  ;;  %v86_v2 = vld [vmem:[%s2735_s0 + $0x18] sm:$0xff] }
  0x17   :  { %1493 = vmatprep.subr.bf16.mxu0 %v2266_v63  ;;  %1523 = vmatpush1.bf16.msra.mxu1 %v2284_v7  ;;  %v79_v45 = vld [vmem:[%s2734_s1 + $0x1f0] sm:$0xff] }
  0x18   :  { %1525 = vmatprep.subr.bf16.mxu1 %v2293_v12  ;;  %v2366_v47 = vpack.c.bf16 %v79_v45, %v75_v43  ;;  %v85_v55 = vld [vmem:[%s2735_s0 + $0x10] sm:$0xff]  ;;  %v1444_v45 = vld [vmem:[%s2735_s0 + $0x20] sm:$0xff] }
  0x1a   :  { %1495 = vmatpush1.bf16.msra.mxu0 %v2287_v10 }
  0x1b   :  { %1497 = vmatprep.subr.bf16.mxu0 %v2302_v15  ;;  %1527 = vmatpush1.bf16.msra.mxu1 %v2320_v25 }
  0x1c   :  { %1529 = vmatprep.subr.bf16.mxu1 %v2329_v29 }
  0x1e   :  { %1499 = vmatpush1.bf16.msra.mxu0 %v2323_v27 }
  0x1f   :  { %1501 = vmatprep.subr.bf16.mxu0 %v2338_v34  ;;  %1531 = vmatpush1.bf16.msra.mxu1 %v2350_v40 }
  0x20   :  { %1533 = vmatprep.subr.bf16.mxu1 %v2356_v42 }
  0x22   :  { %1503 = vmatpush1.bf16.msra.mxu0 %v2353_v41 }
  0x23   :  { %1537 = vmatprep.subr.bf16.mxu0 %v2092_v4  ;;  %1535 = vmatpush1.bf16.msra.mxu1 %v2366_v47 }
  0x24   :  { %1569 = vmatprep.subr.bf16.mxu1 %v2129_v17 }
  0x25   :  { %152 = vmatmul.mubr.f32.vlgmr.msra.gmra.mrb[0].mxu0 %v2065_v3 }
  0x26   :  { %1539 = vmatpush1.bf16.msra.mxu0 %v2103_v8  ;;  %320 = vmatprep.mubr.f32.mxu0 %v2065_v3 }
  0x27   :  { %1541 = vmatprep.subr.bf16.mxu0 %v2105_v9  ;;  %223 = vmatmul.mubr.f32.vlgmr.msra.gmra.mrb[0].mxu1 %v2065_v3 }
  0x28   :  { %1571 = vmatpush1.bf16.msra.mxu1 %v2131_v18  ;;  %391 = vmatprep.mubr.f32.mxu1 %v2065_v3 }
  0x29   :  { %1573 = vmatprep.subr.bf16.mxu1 %v2155_v26 }
  0x2a   :  { %1543 = vmatpush1.bf16.msra.mxu0 %v2127_v16 }
  0x2b   :  { %1545 = vmatprep.subr.bf16.mxu0 %v2143_v22 }
  0x2c   :  { %1575 = vmatpush1.bf16.msra.mxu1 %v2167_v30 }
  0x2d   :  { %1577 = vmatprep.subr.bf16.mxu1 %v2194_v39 }
  0x2e   :  { %1547 = vmatpush1.bf16.msra.mxu0 %v2173_v32 }
  0x2f   :  { %1549 = vmatprep.subr.bf16.mxu0 %v2186_v36 }
  0x30   :  { %1579 = vmatpush1.bf16.msra.mxu1 %v2209_v44 }
  0x31   :  { %1581 = vmatprep.subr.bf16.mxu1 %v2221_v48 }
  0x32   :  { %1551 = vmatpush1.bf16.msra.mxu0 %v2215_v46 }
  0x33   :  { %1553 = vmatprep.subr.bf16.mxu0 %v2230_v51 }
  0x34   :  { %1583 = vmatpush1.bf16.msra.mxu1 %v2248_v57 }
  0x35   :  { %1585 = vmatprep.subr.bf16.mxu1 %v2257_v60 }
  0x36   :  { %1555 = vmatpush1.bf16.msra.mxu0 %v2251_v58 }
  0x37   :  { %1557 = vmatprep.subr.bf16.mxu0 %v2266_v63 }
  0x38   :  { %1587 = vmatpush1.bf16.msra.mxu1 %v2284_v7 }
  0x39   :  { %1589 = vmatprep.subr.bf16.mxu1 %v2293_v12 }
  0x3a   :  { %1559 = vmatpush1.bf16.msra.mxu0 %v2287_v10 }
  0x3b   :  { %1561 = vmatprep.subr.bf16.mxu0 %v2302_v15 }
  0x3c   :  { %1591 = vmatpush1.bf16.msra.mxu1 %v2320_v25 }
  0x3d   :  { %1593 = vmatprep.subr.bf16.mxu1 %v2329_v29 }
  0x3e   :  { %1563 = vmatpush1.bf16.msra.mxu0 %v2323_v27 }
  0x3f   :  { %1565 = vmatprep.subr.bf16.mxu0 %v2338_v34 }
  0x40   :  { %1595 = vmatpush1.bf16.msra.mxu1 %v2350_v40 }
  0x41   :  { %1597 = vmatprep.subr.bf16.mxu1 %v2356_v42 }
  0x42   :  { %1567 = vmatpush1.bf16.msra.mxu0 %v2353_v41 }
  0x43   :  { %1601 = vmatprep.subr.bf16.mxu0 %v2092_v4 }
  0x44   :  { %1599 = vmatpush1.bf16.msra.mxu1 %v2366_v47 }
  0x45   :  { %1633 = vmatprep.subr.bf16.mxu1 %v2129_v17 }
  0xf8   :  { %v153_v52 = vpop.f32.mrb[0].mxu0 }
  0xf9   :  { %v229_v53 = vadd.f32 %v153_v52, %v83_v49  ;;  %v155_v54 = vpop.f32.mrb[1].mxu0  ;;  %v1445_v49 = vld [vmem:[%s2735_s0 + $0x28] sm:$0xff] }
  0xfa   :  { %v230_v56 = vadd.f32 %v155_v54, %v84_v50  ;;  %v224_v61 = vpop.f32.mrb[0].mxu1 }
  0xfb   :  { %v233_v59 = vmul.f32 0.5, %v229_v53  ;;  %v231_v0 = vadd.f32 %v224_v61, %v85_v55  ;;  %v226_v1 = vpop.f32.mrb[1].mxu1 }
  0xfc   :  { %v237_v62 = vmul.f32 0.5, %v230_v56  ;;  %v232_v5 = vadd.f32 %v226_v1, %v86_v2  ;;  %v1446_v56 = vld [vmem:[%s2735_s0 + $0x30] sm:$0xff]  ;;  %v1447_v1 = vld [vmem:[%s2735_s0 + $0x38] sm:$0xff] }
  0xfd   :  { %1985 = vtanh.f32 %v233_v59 }
  0xfe   :  { %1987 = vtanh.f32 %v237_v62  ;;  %v242_v6 = vmul.f32 0.5, %v232_v5 }
  0xff   :  { %1989 = vtanh.f32 %v231_v0 }
 0x100   :  { %1991 = vtanh.f32 %v242_v6 }
 0x107   :  { %v1986_v11 = vpop.eup %1985 }
 0x108   :  { %v1988_v13 = vpop.eup %1987  ;;  %v235_v14 = vmul.f32 0.5, %v1986_v11 }
 0x109   :  { %v1990_v19 = vpop.eup %1989  ;;  %v239_v20 = vmul.f32 0.5, %v1988_v13 }
 0x10a   :  { %v236_v21 = vadd.f32 0.5, %v235_v14  ;;  %v1992_v33 = vpop.eup %1991 }
 0x10b   :  { %v240_v23 = vadd.f32 0.5, %v239_v20  ;;  %v244_v35 = vmul.f32 0.5, %v1992_v33 }
 0x10c   :  { %v247_v24 = vmul.f32 %v1990_v19, %v236_v21 }
 0x10d   :  { %v246_v28 = vmul.f32 0.0, %v240_v23  ;;  %v245_v37 = vadd.f32 0.5, %v244_v35 }
 0x10f   :  { %v2421_v31 = vadd.f32 %v247_v24, %v246_v28 }
 0x111   :  { %1993 = vtanh.f32 %v2421_v31 }
 0x11b   :  { %v1994_v38 = vpop.eup %1993 }
 0x11c   :  { %v250_v43 = vmul.f32 %v1994_v38, %v245_v37 }
 0x11e   :  { %321 = vmatmul.mubr.f32.vlgmr.msra.gmra.mrb[2].mxu0 %v250_v43  ;;  %392 = vmatmul.mubr.f32.vlgmr.msra.gmra.mrb[2].mxu1 %v250_v43 }
 0x11f   :  { %1603 = vmatpush1.bf16.msra.mxu0 %v2103_v8  ;;  %1635 = vmatpush1.bf16.msra.mxu1 %v2131_v18 }
 0x120   :  { %1605 = vmatprep.subr.bf16.mxu0 %v2105_v9  ;;  %1637 = vmatprep.subr.bf16.mxu1 %v2155_v26 }
 0x121   :  { %489 = vmatprep.mubr.f32.mxu0 %v2065_v3  ;;  %560 = vmatprep.mubr.f32.mxu1 %v2065_v3 }
 0x123   :  { %1607 = vmatpush1.bf16.msra.mxu0 %v2127_v16  ;;  %1639 = vmatpush1.bf16.msra.mxu1 %v2167_v30 }
 0x124   :  { %1609 = vmatprep.subr.bf16.mxu0 %v2143_v22  ;;  %1641 = vmatprep.subr.bf16.mxu1 %v2194_v39 }
 0x127   :  { %1611 = vmatpush1.bf16.msra.mxu0 %v2173_v32  ;;  %1643 = vmatpush1.bf16.msra.mxu1 %v2209_v44 }
 0x128   :  { %1613 = vmatprep.subr.bf16.mxu0 %v2186_v36  ;;  %1645 = vmatprep.subr.bf16.mxu1 %v2221_v48 }
 0x12b   :  { %1615 = vmatpush1.bf16.msra.mxu0 %v2215_v46  ;;  %1647 = vmatpush1.bf16.msra.mxu1 %v2248_v57 }
 0x12c   :  { %1617 = vmatprep.subr.bf16.mxu0 %v2230_v51  ;;  %1649 = vmatprep.subr.bf16.mxu1 %v2257_v60 }
 0x12f   :  { %1619 = vmatpush1.bf16.msra.mxu0 %v2251_v58  ;;  %1651 = vmatpush1.bf16.msra.mxu1 %v2284_v7 }
 0x130   :  { %1621 = vmatprep.subr.bf16.mxu0 %v2266_v63  ;;  %1653 = vmatprep.subr.bf16.mxu1 %v2293_v12 }
 0x133   :  { %1623 = vmatpush1.bf16.msra.mxu0 %v2287_v10  ;;  %1655 = vmatpush1.bf16.msra.mxu1 %v2320_v25 }
 0x134   :  { %1625 = vmatprep.subr.bf16.mxu0 %v2302_v15  ;;  %1657 = vmatprep.subr.bf16.mxu1 %v2329_v29 }
 0x137   :  { %1627 = vmatpush1.bf16.msra.mxu0 %v2323_v27  ;;  %1659 = vmatpush1.bf16.msra.mxu1 %v2350_v40 }
 0x138   :  { %1629 = vmatprep.subr.bf16.mxu0 %v2338_v34  ;;  %1661 = vmatprep.subr.bf16.mxu1 %v2356_v42 }
 0x13b   :  { %1631 = vmatpush1.bf16.msra.mxu0 %v2353_v41  ;;  %1663 = vmatpush1.bf16.msra.mxu1 %v2366_v47 }
 0x13c   :  { %1665 = vmatprep.subr.bf16.mxu0 %v2092_v4  ;;  %1697 = vmatprep.subr.bf16.mxu1 %v2129_v17 }
 0x1f1   :  { %v322_v50 = vpop.f32.mrb[2].mxu0  ;;  %v393_v52 = vpop.f32.mrb[2].mxu1 }
 0x1f2   :  { %v398_v53 = vadd.f32 %v1444_v45, %v322_v50  ;;  %v324_v54 = vpop.f32.mrb[3].mxu0  ;;  %v395_v55 = vpop.f32.mrb[3].mxu1  ;;  %v400_v0 = vadd.f32 %v1446_v56, %v393_v52  ;;  %v1449_v45 = vld [vmem:[%s2735_s0 + $0x48] sm:$0xff] }
 0x1f3   :  { %v399_v59 = vadd.f32 %v1445_v49, %v324_v54  ;;  %v401_v2 = vadd.f32 %v1447_v1, %v395_v55  ;;  %v1450_v55 = vld [vmem:[%s2735_s0 + $0x50] sm:$0xff] }
 0x1f4   :  { %v402_v61 = vmul.f32 0.5, %v398_v53 }
 0x1f5   :  { %v406_v62 = vmul.f32 0.5, %v399_v59  ;;  %v411_v5 = vmul.f32 0.5, %v401_v2 }
 0x1f6   :  { %1995 = vtanh.f32 %v402_v61 }
 0x1f7   :  { %1997 = vtanh.f32 %v406_v62 }
 0x1f8   :  { %1999 = vtanh.f32 %v400_v0  ;;  %v1451_v0 = vld [vmem:[%s2735_s0 + $0x58] sm:$0xff] }
 0x1f9   :  { %2001 = vtanh.f32 %v411_v5 }
 0x200   :  { %v1996_v6 = vpop.eup %1995 }
 0x201   :  { %v1998_v11 = vpop.eup %1997  ;;  %v404_v13 = vmul.f32 0.5, %v1996_v6 }
 0x202   :  { %v408_v14 = vmul.f32 0.5, %v1998_v11  ;;  %v2000_v20 = vpop.eup %1999 }
 0x203   :  { %v405_v19 = vadd.f32 0.5, %v404_v13  ;;  %v2002_v33 = vpop.eup %2001 }
 0x204   :  { %v409_v21 = vadd.f32 0.5, %v408_v14  ;;  %v413_v35 = vmul.f32 0.5, %v2002_v33 }
 0x205   :  { %v416_v23 = vmul.f32 %v2000_v20, %v405_v19 }
 0x206   :  { %v415_v24 = vmul.f32 %v409_v21, %v2421_v31  ;;  %v414_v37 = vadd.f32 0.5, %v413_v35  ;;  %v1448_v31 = vld [vmem:[%s2735_s0 + $0x40] sm:$0xff] }
 0x208   :  { %v2471_v28 = vadd.f32 %v416_v23, %v415_v24 }
 0x20a   :  { %2003 = vtanh.f32 %v2471_v28 }
 0x214   :  { %v2004_v38 = vpop.eup %2003 }
 0x215   :  { %v419_v43 = vmul.f32 %v2004_v38, %v414_v37 }
 0x217   :  { %490 = vmatmul.mubr.f32.vlgmr.msra.gmra.mrb[4].mxu0 %v419_v43  ;;  %561 = vmatmul.mubr.f32.vlgmr.msra.gmra.mrb[4].mxu1 %v419_v43 }
 0x218   :  { %1667 = vmatpush1.bf16.msra.mxu0 %v2103_v8  ;;  %1699 = vmatpush1.bf16.msra.mxu1 %v2131_v18 }
 0x219   :  { %1669 = vmatprep.subr.bf16.mxu0 %v2105_v9  ;;  %1701 = vmatprep.subr.bf16.mxu1 %v2155_v26 }
 0x21a   :  { %658 = vmatprep.mubr.f32.mxu0 %v2065_v3  ;;  %729 = vmatprep.mubr.f32.mxu1 %v2065_v3 }
 0x21c   :  { %1671 = vmatpush1.bf16.msra.mxu0 %v2127_v16  ;;  %1703 = vmatpush1.bf16.msra.mxu1 %v2167_v30 }
 0x21d   :  { %1673 = vmatprep.subr.bf16.mxu0 %v2143_v22  ;;  %1705 = vmatprep.subr.bf16.mxu1 %v2194_v39 }
 0x220   :  { %1675 = vmatpush1.bf16.msra.mxu0 %v2173_v32  ;;  %1707 = vmatpush1.bf16.msra.mxu1 %v2209_v44 }
 0x221   :  { %1677 = vmatprep.subr.bf16.mxu0 %v2186_v36  ;;  %1709 = vmatprep.subr.bf16.mxu1 %v2221_v48 }
 0x224   :  { %1679 = vmatpush1.bf16.msra.mxu0 %v2215_v46  ;;  %1711 = vmatpush1.bf16.msra.mxu1 %v2248_v57 }
 0x225   :  { %1681 = vmatprep.subr.bf16.mxu0 %v2230_v51  ;;  %1713 = vmatprep.subr.bf16.mxu1 %v2257_v60 }
 0x228   :  { %1683 = vmatpush1.bf16.msra.mxu0 %v2251_v58  ;;  %1715 = vmatpush1.bf16.msra.mxu1 %v2284_v7 }
 0x229   :  { %1685 = vmatprep.subr.bf16.mxu0 %v2266_v63  ;;  %1717 = vmatprep.subr.bf16.mxu1 %v2293_v12 }
 0x22c   :  { %1687 = vmatpush1.bf16.msra.mxu0 %v2287_v10  ;;  %1719 = vmatpush1.bf16.msra.mxu1 %v2320_v25 }
 0x22d   :  { %1689 = vmatprep.subr.bf16.mxu0 %v2302_v15  ;;  %1721 = vmatprep.subr.bf16.mxu1 %v2329_v29 }
 0x230   :  { %1691 = vmatpush1.bf16.msra.mxu0 %v2323_v27  ;;  %1723 = vmatpush1.bf16.msra.mxu1 %v2350_v40 }
 0x231   :  { %1693 = vmatprep.subr.bf16.mxu0 %v2338_v34  ;;  %1725 = vmatprep.subr.bf16.mxu1 %v2356_v42 }
 0x234   :  { %1695 = vmatpush1.bf16.msra.mxu0 %v2353_v41  ;;  %1727 = vmatpush1.bf16.msra.mxu1 %v2366_v47 }
 0x235   :  { %1729 = vmatprep.subr.bf16.mxu0 %v2092_v4  ;;  %1761 = vmatprep.subr.bf16.mxu1 %v2129_v17 }
 0x2ea   :  { %v491_v49 = vpop.f32.mrb[4].mxu0  ;;  %v562_v50 = vpop.f32.mrb[4].mxu1 }
 0x2eb   :  { %v567_v52 = vadd.f32 %v1448_v31, %v491_v49  ;;  %v493_v53 = vpop.f32.mrb[5].mxu0  ;;  %v564_v54 = vpop.f32.mrb[5].mxu1  ;;  %v569_v62 = vadd.f32 %v1450_v55, %v562_v50  ;;  %v1453_v31 = vld [vmem:[%s2735_s0 + $0x68] sm:$0xff] }
 0x2ec   :  { %v568_v56 = vadd.f32 %v1449_v45, %v493_v53  ;;  %v570_v1 = vadd.f32 %v1451_v0, %v564_v54  ;;  %v1454_v54 = vld [vmem:[%s2735_s0 + $0x70] sm:$0xff] }
 0x2ed   :  { %v571_v59 = vmul.f32 0.5, %v567_v52 }
 0x2ee   :  { %v575_v61 = vmul.f32 0.5, %v568_v56  ;;  %v580_v2 = vmul.f32 0.5, %v570_v1 }
 0x2ef   :  { %2005 = vtanh.f32 %v571_v59 }
 0x2f0   :  { %2007 = vtanh.f32 %v575_v61 }
 0x2f1   :  { %2009 = vtanh.f32 %v569_v62  ;;  %v1455_v62 = vld [vmem:[%s2735_s0 + $0x78] sm:$0xff] }
 0x2f2   :  { %2011 = vtanh.f32 %v580_v2 }
 0x2f9   :  { %v2006_v5 = vpop.eup %2005 }
 0x2fa   :  { %v2008_v6 = vpop.eup %2007  ;;  %v573_v11 = vmul.f32 0.5, %v2006_v5 }
 0x2fb   :  { %v577_v13 = vmul.f32 0.5, %v2008_v6  ;;  %v2010_v19 = vpop.eup %2009 }
 0x2fc   :  { %v574_v14 = vadd.f32 0.5, %v573_v11  ;;  %v2012_v33 = vpop.eup %2011 }
 0x2fd   :  { %v578_v20 = vadd.f32 0.5, %v577_v13  ;;  %v582_v35 = vmul.f32 0.5, %v2012_v33 }
 0x2fe   :  { %v585_v21 = vmul.f32 %v2010_v19, %v574_v14 }
 0x2ff   :  { %v584_v23 = vmul.f32 %v578_v20, %v2471_v28  ;;  %v583_v37 = vadd.f32 0.5, %v582_v35  ;;  %v1452_v28 = vld [vmem:[%s2735_s0 + $0x60] sm:$0xff] }
 0x301   :  { %v2521_v24 = vadd.f32 %v585_v21, %v584_v23 }
 0x303   :  { %2013 = vtanh.f32 %v2521_v24 }
 0x30d   :  { %v2014_v38 = vpop.eup %2013 }
 0x30e   :  { %v588_v43 = vmul.f32 %v2014_v38, %v583_v37 }
 0x310   :  { %659 = vmatmul.mubr.f32.vlgmr.msra.gmra.mrb[6].mxu0 %v588_v43  ;;  %730 = vmatmul.mubr.f32.vlgmr.msra.gmra.mrb[6].mxu1 %v588_v43 }
 0x311   :  { %1731 = vmatpush1.bf16.msra.mxu0 %v2103_v8  ;;  %1763 = vmatpush1.bf16.msra.mxu1 %v2131_v18 }
 0x312   :  { %1733 = vmatprep.subr.bf16.mxu0 %v2105_v9  ;;  %1765 = vmatprep.subr.bf16.mxu1 %v2155_v26 }
 0x313   :  { %827 = vmatprep.mubr.f32.mxu0 %v2065_v3  ;;  %898 = vmatprep.mubr.f32.mxu1 %v2065_v3 }
 0x315   :  { %1735 = vmatpush1.bf16.msra.mxu0 %v2127_v16  ;;  %1767 = vmatpush1.bf16.msra.mxu1 %v2167_v30 }
 0x316   :  { %1737 = vmatprep.subr.bf16.mxu0 %v2143_v22  ;;  %1769 = vmatprep.subr.bf16.mxu1 %v2194_v39 }
 0x319   :  { %1739 = vmatpush1.bf16.msra.mxu0 %v2173_v32  ;;  %1771 = vmatpush1.bf16.msra.mxu1 %v2209_v44 }
 0x31a   :  { %1741 = vmatprep.subr.bf16.mxu0 %v2186_v36  ;;  %1773 = vmatprep.subr.bf16.mxu1 %v2221_v48 }
 0x31d   :  { %1743 = vmatpush1.bf16.msra.mxu0 %v2215_v46  ;;  %1775 = vmatpush1.bf16.msra.mxu1 %v2248_v57 }
 0x31e   :  { %1745 = vmatprep.subr.bf16.mxu0 %v2230_v51  ;;  %1777 = vmatprep.subr.bf16.mxu1 %v2257_v60 }
 0x321   :  { %1747 = vmatpush1.bf16.msra.mxu0 %v2251_v58  ;;  %1779 = vmatpush1.bf16.msra.mxu1 %v2284_v7 }
 0x322   :  { %1749 = vmatprep.subr.bf16.mxu0 %v2266_v63  ;;  %1781 = vmatprep.subr.bf16.mxu1 %v2293_v12 }
 0x325   :  { %1751 = vmatpush1.bf16.msra.mxu0 %v2287_v10  ;;  %1783 = vmatpush1.bf16.msra.mxu1 %v2320_v25 }
 0x326   :  { %1753 = vmatprep.subr.bf16.mxu0 %v2302_v15  ;;  %1785 = vmatprep.subr.bf16.mxu1 %v2329_v29 }
 0x329   :  { %1755 = vmatpush1.bf16.msra.mxu0 %v2323_v27  ;;  %1787 = vmatpush1.bf16.msra.mxu1 %v2350_v40 }
 0x32a   :  { %1757 = vmatprep.subr.bf16.mxu0 %v2338_v34  ;;  %1789 = vmatprep.subr.bf16.mxu1 %v2356_v42 }
 0x32d   :  { %1759 = vmatpush1.bf16.msra.mxu0 %v2353_v41  ;;  %1791 = vmatpush1.bf16.msra.mxu1 %v2366_v47 }
 0x32e   :  { %1793 = vmatprep.subr.bf16.mxu0 %v2092_v4  ;;  %1825 = vmatprep.subr.bf16.mxu1 %v2129_v17 }
 0x3e3   :  { %v660_v45 = vpop.f32.mrb[6].mxu0  ;;  %v731_v49 = vpop.f32.mrb[6].mxu1 }
 0x3e4   :  { %v736_v50 = vadd.f32 %v1452_v28, %v660_v45  ;;  %v662_v52 = vpop.f32.mrb[7].mxu0  ;;  %v733_v53 = vpop.f32.mrb[7].mxu1  ;;  %v738_v61 = vadd.f32 %v1454_v54, %v731_v49  ;;  %v1457_v28 = vld [vmem:[%s2735_s0 + $0x88] sm:$0xff] }
 0x3e5   :  { %v737_v55 = vadd.f32 %v1453_v31, %v662_v52  ;;  %v739_v0 = vadd.f32 %v1455_v62, %v733_v53  ;;  %v1458_v53 = vld [vmem:[%s2735_s0 + $0x90] sm:$0xff] }
 0x3e6   :  { %v740_v56 = vmul.f32 0.5, %v736_v50 }
 0x3e7   :  { %v744_v59 = vmul.f32 0.5, %v737_v55  ;;  %v749_v1 = vmul.f32 0.5, %v739_v0 }
 0x3e8   :  { %2015 = vtanh.f32 %v740_v56 }
 0x3e9   :  { %2017 = vtanh.f32 %v744_v59 }
 0x3ea   :  { %2019 = vtanh.f32 %v738_v61  ;;  %v1459_v61 = vld [vmem:[%s2735_s0 + $0x98] sm:$0xff] }
 0x3eb   :  { %2021 = vtanh.f32 %v749_v1 }
 0x3f2   :  { %v2016_v2 = vpop.eup %2015 }
 0x3f3   :  { %v2018_v5 = vpop.eup %2017  ;;  %v742_v6 = vmul.f32 0.5, %v2016_v2 }
 0x3f4   :  { %v746_v11 = vmul.f32 0.5, %v2018_v5  ;;  %v2020_v14 = vpop.eup %2019 }
 0x3f5   :  { %v743_v13 = vadd.f32 0.5, %v742_v6  ;;  %v2022_v33 = vpop.eup %2021 }
 0x3f6   :  { %v747_v19 = vadd.f32 0.5, %v746_v11  ;;  %v751_v35 = vmul.f32 0.5, %v2022_v33 }
 0x3f7   :  { %v754_v20 = vmul.f32 %v2020_v14, %v743_v13 }
 0x3f8   :  { %v753_v21 = vmul.f32 %v747_v19, %v2521_v24  ;;  %v752_v37 = vadd.f32 0.5, %v751_v35  ;;  %v1456_v24 = vld [vmem:[%s2735_s0 + $0x80] sm:$0xff] }
 0x3fa   :  { %v2571_v23 = vadd.f32 %v754_v20, %v753_v21 }
 0x3fc   :  { %2023 = vtanh.f32 %v2571_v23 }
 0x406   :  { %v2024_v38 = vpop.eup %2023 }
 0x407   :  { %v757_v43 = vmul.f32 %v2024_v38, %v752_v37 }
 0x409   :  { %828 = vmatmul.mubr.f32.vlgmr.msra.gmra.mrb[8].mxu0 %v757_v43  ;;  %899 = vmatmul.mubr.f32.vlgmr.msra.gmra.mrb[8].mxu1 %v757_v43 }
 0x40a   :  { %1795 = vmatpush1.bf16.msra.mxu0 %v2103_v8  ;;  %1827 = vmatpush1.bf16.msra.mxu1 %v2131_v18 }
 0x40b   :  { %1797 = vmatprep.subr.bf16.mxu0 %v2105_v9  ;;  %1829 = vmatprep.subr.bf16.mxu1 %v2155_v26 }
 0x40c   :  { %996 = vmatprep.mubr.f32.mxu0 %v2065_v3  ;;  %1067 = vmatprep.mubr.f32.mxu1 %v2065_v3 }
 0x40e   :  { %1799 = vmatpush1.bf16.msra.mxu0 %v2127_v16  ;;  %1831 = vmatpush1.bf16.msra.mxu1 %v2167_v30 }
 0x40f   :  { %1801 = vmatprep.subr.bf16.mxu0 %v2143_v22  ;;  %1833 = vmatprep.subr.bf16.mxu1 %v2194_v39 }
 0x412   :  { %1803 = vmatpush1.bf16.msra.mxu0 %v2173_v32  ;;  %1835 = vmatpush1.bf16.msra.mxu1 %v2209_v44 }
 0x413   :  { %1805 = vmatprep.subr.bf16.mxu0 %v2186_v36  ;;  %1837 = vmatprep.subr.bf16.mxu1 %v2221_v48 }
 0x416   :  { %1807 = vmatpush1.bf16.msra.mxu0 %v2215_v46  ;;  %1839 = vmatpush1.bf16.msra.mxu1 %v2248_v57 }
 0x417   :  { %1809 = vmatprep.subr.bf16.mxu0 %v2230_v51  ;;  %1841 = vmatprep.subr.bf16.mxu1 %v2257_v60 }
 0x41a   :  { %1811 = vmatpush1.bf16.msra.mxu0 %v2251_v58  ;;  %1843 = vmatpush1.bf16.msra.mxu1 %v2284_v7 }
 0x41b   :  { %1813 = vmatprep.subr.bf16.mxu0 %v2266_v63  ;;  %1845 = vmatprep.subr.bf16.mxu1 %v2293_v12 }
 0x41e   :  { %1815 = vmatpush1.bf16.msra.mxu0 %v2287_v10  ;;  %1847 = vmatpush1.bf16.msra.mxu1 %v2320_v25 }
 0x41f   :  { %1817 = vmatprep.subr.bf16.mxu0 %v2302_v15  ;;  %1849 = vmatprep.subr.bf16.mxu1 %v2329_v29 }
 0x422   :  { %1819 = vmatpush1.bf16.msra.mxu0 %v2323_v27  ;;  %1851 = vmatpush1.bf16.msra.mxu1 %v2350_v40 }
 0x423   :  { %1821 = vmatprep.subr.bf16.mxu0 %v2338_v34  ;;  %1853 = vmatprep.subr.bf16.mxu1 %v2356_v42 }
 0x426   :  { %1823 = vmatpush1.bf16.msra.mxu0 %v2353_v41  ;;  %1855 = vmatpush1.bf16.msra.mxu1 %v2366_v47 }
 0x427   :  { %1857 = vmatprep.subr.bf16.mxu0 %v2092_v4  ;;  %1889 = vmatprep.subr.bf16.mxu1 %v2129_v17 }
 0x4dc   :  { %v829_v31 = vpop.f32.mrb[8].mxu0  ;;  %v900_v45 = vpop.f32.mrb[8].mxu1 }
 0x4dd   :  { %v905_v49 = vadd.f32 %v1456_v24, %v829_v31  ;;  %v831_v50 = vpop.f32.mrb[9].mxu0  ;;  %v902_v52 = vpop.f32.mrb[9].mxu1  ;;  %v907_v59 = vadd.f32 %v1458_v53, %v900_v45  ;;  %v1461_v24 = vld [vmem:[%s2735_s0 + $0xa8] sm:$0xff] }
 0x4de   :  { %v906_v54 = vadd.f32 %v1457_v28, %v831_v50  ;;  %v908_v62 = vadd.f32 %v1459_v61, %v902_v52  ;;  %v1462_v52 = vld [vmem:[%s2735_s0 + $0xb0] sm:$0xff] }
 0x4df   :  { %v909_v55 = vmul.f32 0.5, %v905_v49 }
 0x4e0   :  { %v913_v56 = vmul.f32 0.5, %v906_v54  ;;  %v918_v0 = vmul.f32 0.5, %v908_v62 }
 0x4e1   :  { %2025 = vtanh.f32 %v909_v55  ;;  %v1463_v55 = vld [vmem:[%s2735_s0 + $0xb8] sm:$0xff] }
 0x4e2   :  { %2027 = vtanh.f32 %v913_v56 }
 0x4e3   :  { %2029 = vtanh.f32 %v907_v59 }
 0x4e4   :  { %2031 = vtanh.f32 %v918_v0 }
 0x4eb   :  { %v2026_v1 = vpop.eup %2025 }
 0x4ec   :  { %v2028_v2 = vpop.eup %2027  ;;  %v911_v5 = vmul.f32 0.5, %v2026_v1 }
 0x4ed   :  { %v915_v6 = vmul.f32 0.5, %v2028_v2  ;;  %v2030_v13 = vpop.eup %2029 }
 0x4ee   :  { %v912_v11 = vadd.f32 0.5, %v911_v5  ;;  %v2032_v33 = vpop.eup %2031 }
 0x4ef   :  { %v916_v14 = vadd.f32 0.5, %v915_v6  ;;  %v920_v35 = vmul.f32 0.5, %v2032_v33 }
 0x4f0   :  { %v923_v19 = vmul.f32 %v2030_v13, %v912_v11 }
 0x4f1   :  { %v922_v20 = vmul.f32 %v916_v14, %v2571_v23  ;;  %v921_v37 = vadd.f32 0.5, %v920_v35  ;;  %v1460_v23 = vld [vmem:[%s2735_s0 + $0xa0] sm:$0xff] }
 0x4f3   :  { %v2621_v21 = vadd.f32 %v923_v19, %v922_v20 }
 0x4f5   :  { %2033 = vtanh.f32 %v2621_v21 }
 0x4ff   :  { %v2034_v38 = vpop.eup %2033 }
 0x500   :  { %v926_v43 = vmul.f32 %v2034_v38, %v921_v37 }
 0x502   :  { %997 = vmatmul.mubr.f32.vlgmr.msra.gmra.mrb[10].mxu0 %v926_v43  ;;  %1068 = vmatmul.mubr.f32.vlgmr.msra.gmra.mrb[10].mxu1 %v926_v43 }
 0x503   :  { %1859 = vmatpush1.bf16.msra.mxu0 %v2103_v8  ;;  %1891 = vmatpush1.bf16.msra.mxu1 %v2131_v18 }
 0x504   :  { %1861 = vmatprep.subr.bf16.mxu0 %v2105_v9  ;;  %1893 = vmatprep.subr.bf16.mxu1 %v2155_v26 }
 0x505   :  { %1165 = vmatprep.mubr.f32.mxu0 %v2065_v3  ;;  %1236 = vmatprep.mubr.f32.mxu1 %v2065_v3 }
 0x507   :  { %1863 = vmatpush1.bf16.msra.mxu0 %v2127_v16  ;;  %1895 = vmatpush1.bf16.msra.mxu1 %v2167_v30 }
 0x508   :  { %1865 = vmatprep.subr.bf16.mxu0 %v2143_v22  ;;  %1897 = vmatprep.subr.bf16.mxu1 %v2194_v39 }
 0x50b   :  { %1867 = vmatpush1.bf16.msra.mxu0 %v2173_v32  ;;  %1899 = vmatpush1.bf16.msra.mxu1 %v2209_v44 }
 0x50c   :  { %1869 = vmatprep.subr.bf16.mxu0 %v2186_v36  ;;  %1901 = vmatprep.subr.bf16.mxu1 %v2221_v48 }
 0x50f   :  { %1871 = vmatpush1.bf16.msra.mxu0 %v2215_v46  ;;  %1903 = vmatpush1.bf16.msra.mxu1 %v2248_v57 }
 0x510   :  { %1873 = vmatprep.subr.bf16.mxu0 %v2230_v51  ;;  %1905 = vmatprep.subr.bf16.mxu1 %v2257_v60 }
 0x513   :  { %1875 = vmatpush1.bf16.msra.mxu0 %v2251_v58  ;;  %1907 = vmatpush1.bf16.msra.mxu1 %v2284_v7 }
 0x514   :  { %1877 = vmatprep.subr.bf16.mxu0 %v2266_v63  ;;  %1909 = vmatprep.subr.bf16.mxu1 %v2293_v12 }
 0x517   :  { %1879 = vmatpush1.bf16.msra.mxu0 %v2287_v10  ;;  %1911 = vmatpush1.bf16.msra.mxu1 %v2320_v25 }
 0x518   :  { %1881 = vmatprep.subr.bf16.mxu0 %v2302_v15  ;;  %1913 = vmatprep.subr.bf16.mxu1 %v2329_v29 }
 0x51b   :  { %1883 = vmatpush1.bf16.msra.mxu0 %v2323_v27  ;;  %1915 = vmatpush1.bf16.msra.mxu1 %v2350_v40 }
 0x51c   :  { %1885 = vmatprep.subr.bf16.mxu0 %v2338_v34  ;;  %1917 = vmatprep.subr.bf16.mxu1 %v2356_v42 }
 0x51f   :  { %1887 = vmatpush1.bf16.msra.mxu0 %v2353_v41  ;;  %1919 = vmatpush1.bf16.msra.mxu1 %v2366_v47 }
 0x520   :  { %1921 = vmatprep.subr.bf16.mxu0 %v2092_v4  ;;  %1953 = vmatprep.subr.bf16.mxu1 %v2129_v17 }
 0x5d5   :  { %v998_v28 = vpop.f32.mrb[10].mxu0  ;;  %v1069_v31 = vpop.f32.mrb[10].mxu1 }
 0x5d6   :  { %v1074_v45 = vadd.f32 %v1460_v23, %v998_v28  ;;  %v1000_v49 = vpop.f32.mrb[11].mxu0  ;;  %v1071_v50 = vpop.f32.mrb[11].mxu1  ;;  %v1076_v54 = vadd.f32 %v1462_v52, %v1069_v31  ;;  %v1470_v31 = vld [vmem:[%s2735_s0 + $0xf0] sm:$0xff] }
 0x5d7   :  { %v1075_v4 = vadd.f32 %v1461_v24, %v1000_v49  ;;  %v1077_v56 = vadd.f32 %v1463_v55, %v1071_v50 }
 0x5d8   :  { %v1078_v53 = vmul.f32 0.5, %v1074_v45 }
 0x5d9   :  { %v1082_v17 = vmul.f32 0.5, %v1075_v4  ;;  %v1087_v59 = vmul.f32 0.5, %v1077_v56  ;;  %v1471_v4 = vld [vmem:[%s2735_s0 + $0xf8] sm:$0xff] }
 0x5da   :  { %2035 = vtanh.f32 %v1078_v53 }
 0x5db   :  { %2037 = vtanh.f32 %v1082_v17 }
 0x5dc   :  { %2039 = vtanh.f32 %v1076_v54 }
 0x5dd   :  { %2041 = vtanh.f32 %v1087_v59 }
 0x5e4   :  { %v2036_v61 = vpop.eup %2035 }
 0x5e5   :  { %v2038_v62 = vpop.eup %2037  ;;  %v1080_v0 = vmul.f32 0.5, %v2036_v61 }
 0x5e6   :  { %v1084_v1 = vmul.f32 0.5, %v2038_v62  ;;  %v2040_v5 = vpop.eup %2039 }
 0x5e7   :  { %v1081_v2 = vadd.f32 0.5, %v1080_v0  ;;  %v2042_v19 = vpop.eup %2041 }
 0x5e8   :  { %v1085_v6 = vadd.f32 0.5, %v1084_v1  ;;  %v1089_v20 = vmul.f32 0.5, %v2042_v19 }
 0x5e9   :  { %v1092_v11 = vmul.f32 %v2040_v5, %v1081_v2 }
 0x5ea   :  { %v1091_v13 = vmul.f32 %v1085_v6, %v2621_v21  ;;  %v1090_v33 = vadd.f32 0.5, %v1089_v20  ;;  %v1469_v21 = vld [vmem:[%s2735_s0 + $0xe8] sm:$0xff] }
 0x5ec   :  { %v2671_v14 = vadd.f32 %v1092_v11, %v1091_v13 }
 0x5ee   :  { %2043 = vtanh.f32 %v2671_v14 }
 0x5f8   :  { %v2044_v35 = vpop.eup %2043 }
 0x5f9   :  { %v1095_v37 = vmul.f32 %v2044_v35, %v1090_v33 }
 0x5fb   :  { %1166 = vmatmul.mubr.f32.vlgmr.msra.gmra.mrb[12].mxu0 %v1095_v37  ;;  %1237 = vmatmul.mubr.f32.vlgmr.msra.gmra.mrb[12].mxu1 %v1095_v37 }
 0x5fc   :  { %1923 = vmatpush1.bf16.msra.mxu0 %v2103_v8  ;;  %1955 = vmatpush1.bf16.msra.mxu1 %v2131_v18  ;;  %v1465_v8 = vld [vmem:[%s2735_s0 + $0xc8] sm:$0xff] }
 0x5fd   :  { %1925 = vmatprep.subr.bf16.mxu0 %v2105_v9  ;;  %1957 = vmatprep.subr.bf16.mxu1 %v2155_v26 }
 0x5fe   :  { %1334 = vmatprep.mubr.f32.mxu0 %v2065_v3  ;;  %1405 = vmatprep.mubr.f32.mxu1 %v2065_v3  ;;  %v1464_v3 = vld [vmem:[%s2735_s0 + $0xc0] sm:$0xff] }
 0x600   :  { %1927 = vmatpush1.bf16.msra.mxu0 %v2127_v16  ;;  %1959 = vmatpush1.bf16.msra.mxu1 %v2167_v30  ;;  %v1466_v30 = vld [vmem:[%s2735_s0 + $0xd0] sm:$0xff] }
 0x601   :  { %1929 = vmatprep.subr.bf16.mxu0 %v2143_v22  ;;  %1961 = vmatprep.subr.bf16.mxu1 %v2194_v39 }
 0x604   :  { %1931 = vmatpush1.bf16.msra.mxu0 %v2173_v32  ;;  %1963 = vmatpush1.bf16.msra.mxu1 %v2209_v44 }
 0x605   :  { %1933 = vmatprep.subr.bf16.mxu0 %v2186_v36  ;;  %1965 = vmatprep.subr.bf16.mxu1 %v2221_v48 }
 0x608   :  { %1935 = vmatpush1.bf16.msra.mxu0 %v2215_v46  ;;  %1967 = vmatpush1.bf16.msra.mxu1 %v2248_v57  ;;  %v1467_v46 = vld [vmem:[%s2735_s0 + $0xd8] sm:$0xff] }
 0x609   :  { %1937 = vmatprep.subr.bf16.mxu0 %v2230_v51  ;;  %1969 = vmatprep.subr.bf16.mxu1 %v2257_v60 }
 0x60c   :  { %1939 = vmatpush1.bf16.msra.mxu0 %v2251_v58  ;;  %1971 = vmatpush1.bf16.msra.mxu1 %v2284_v7 }
 0x60d   :  { %1941 = vmatprep.subr.bf16.mxu0 %v2266_v63  ;;  %1973 = vmatprep.subr.bf16.mxu1 %v2293_v12 }
 0x610   :  { %1943 = vmatpush1.bf16.msra.mxu0 %v2287_v10  ;;  %1975 = vmatpush1.bf16.msra.mxu1 %v2320_v25 }
 0x611   :  { %1945 = vmatprep.subr.bf16.mxu0 %v2302_v15  ;;  %1977 = vmatprep.subr.bf16.mxu1 %v2329_v29 }
 0x614   :  { %1947 = vmatpush1.bf16.msra.mxu0 %v2323_v27  ;;  %1979 = vmatpush1.bf16.msra.mxu1 %v2350_v40 }
 0x615   :  { %1949 = vmatprep.subr.bf16.mxu0 %v2338_v34  ;;  %1981 = vmatprep.subr.bf16.mxu1 %v2356_v42 }
 0x618   :  { %1951 = vmatpush1.bf16.msra.mxu0 %v2353_v41  ;;  %1983 = vmatpush1.bf16.msra.mxu1 %v2366_v47  ;;  %v1468_v47 = vld [vmem:[%s2735_s0 + $0xe0] sm:$0xff] }
 0x6ce   :  { %v1167_v9 = vpop.f32.mrb[12].mxu0  ;;  %v1238_v16 = vpop.f32.mrb[12].mxu1 }
 0x6cf   :  { %v1243_v18 = vadd.f32 %v1464_v3, %v1167_v9  ;;  %v1169_v22 = vpop.f32.mrb[13].mxu0  ;;  %v1240_v26 = vpop.f32.mrb[13].mxu1  ;;  %v1245_v44 = vadd.f32 %v1466_v30, %v1238_v16 }
 0x6d0   :  { %v1244_v32 = vadd.f32 %v1465_v8, %v1169_v22  ;;  %v1246_v48 = vadd.f32 %v1467_v46, %v1240_v26 }
 0x6d1   :  { %v1247_v36 = vmul.f32 0.5, %v1243_v18 }
 0x6d2   :  { %v1251_v39 = vmul.f32 0.5, %v1244_v32  ;;  %v1256_v51 = vmul.f32 0.5, %v1246_v48 }
 0x6d3   :  { %2045 = vtanh.f32 %v1247_v36 }
 0x6d4   :  { %2047 = vtanh.f32 %v1251_v39 }
 0x6d5   :  { %2049 = vtanh.f32 %v1245_v44 }
 0x6d6   :  { %2051 = vtanh.f32 %v1256_v51 }
 0x6dd   :  { %v2046_v57 = vpop.eup %2045 }
 0x6de   :  { %v2048_v58 = vpop.eup %2047  ;;  %v1249_v60 = vmul.f32 0.5, %v2046_v57 }
 0x6df   :  { %v1253_v63 = vmul.f32 0.5, %v2048_v58  ;;  %v2050_v10 = vpop.eup %2049 }
 0x6e0   :  { %v1250_v7 = vadd.f32 0.5, %v1249_v60  ;;  %v2052_v29 = vpop.eup %2051 }
 0x6e1   :  { %v1254_v12 = vadd.f32 0.5, %v1253_v63  ;;  %v1258_v34 = vmul.f32 0.5, %v2052_v29 }
 0x6e2   :  { %v1261_v15 = vmul.f32 %v2050_v10, %v1250_v7 }
 0x6e3   :  { %v1260_v25 = vmul.f32 %v1254_v12, %v2671_v14  ;;  %v1259_v40 = vadd.f32 0.5, %v1258_v34 }
 0x6e5   :  { %v1262_v27 = vadd.f32 %v1261_v15, %v1260_v25 }
 0x6e7   :  { %2053 = vtanh.f32 %v1262_v27 }
 0x6f1   :  { %v2054_v41 = vpop.eup %2053 }
 0x6f2   :  { %v1264_v42 = vmul.f32 %v2054_v41, %v1259_v40 }
 0x6f4   :  { %1335 = vmatmul.mubr.f32.vlgmr.msra.gmra.mrb[14].mxu0 %v1264_v42  ;;  %1406 = vmatmul.mubr.f32.vlgmr.msra.gmra.mrb[14].mxu1 %v1264_v42 }
 0x7c7   :  { %v1336_v38 = vpop.f32.mrb[14].mxu0  ;;  %v1407_v43 = vpop.f32.mrb[14].mxu1 }
 0x7c8   :  { %v1412_v23 = vadd.f32 %v1468_v47, %v1336_v38  ;;  %v1338_v24 = vpop.f32.mrb[15].mxu0  ;;  %v1409_v28 = vpop.f32.mrb[15].mxu1  ;;  %v1414_v52 = vadd.f32 %v1470_v31, %v1407_v43 }
 0x7c9   :  { %v1413_v45 = vadd.f32 %v1469_v21, %v1338_v24  ;;  %v1415_v53 = vadd.f32 %v1471_v4, %v1409_v28 }
 0x7ca   :  { %v1416_v49 = vmul.f32 0.5, %v1412_v23 }
 0x7cb   :  { %v1420_v50 = vmul.f32 0.5, %v1413_v45  ;;  %v1425_v17 = vmul.f32 0.5, %v1415_v53 }
 0x7cc   :  { %2055 = vtanh.f32 %v1416_v49 }
 0x7cd   :  { %2057 = vtanh.f32 %v1420_v50 }
 0x7ce   :  { %2059 = vtanh.f32 %v1414_v52 }
 0x7cf   :  { %2061 = vtanh.f32 %v1425_v17 }
 0x7d6   :  { %v2056_v54 = vpop.eup %2055 }
 0x7d7   :  { %v2058_v55 = vpop.eup %2057  ;;  %v1418_v56 = vmul.f32 0.5, %v2056_v54 }
 0x7d8   :  { %v1422_v59 = vmul.f32 0.5, %v2058_v55  ;;  %v2060_v62 = vpop.eup %2059 }
 0x7d9   :  { %v1419_v61 = vadd.f32 0.5, %v1418_v56  ;;  %v2062_v6 = vpop.eup %2061 }
 0x7da   :  { %v1423_v0 = vadd.f32 0.5, %v1422_v59  ;;  %v1427_v11 = vmul.f32 0.5, %v2062_v6 }
 0x7db   :  { %v1430_v1 = vmul.f32 %v2060_v62, %v1419_v61 }
 0x7dc   :  { %v1429_v2 = vmul.f32 %v1423_v0, %v1262_v27  ;;  %v1428_v13 = vadd.f32 0.5, %v1427_v11 }
 0x7de   :  { %v1431_v5 = vadd.f32 %v1430_v1, %v1429_v2 }
 0x7e0   :  { %2063 = vtanh.f32 %v1431_v5 }
 0x7ea   :  { %v2064_v14 = vpop.eup %2063 }
 0x7eb   :  { %v1433_v19 = vmul.f32 %v2064_v14, %v1428_v13 }
 0x7ed   :  { %1439 = vst [vmem:[%s2736_s2] sm:$0xff] %v1433_v19 }

</bundles_post_ra>
